<compile_context>
chip_gen: v7x
topology: tpu7x:2x2x1
jax: 0.10.0
libtpu: 0.0.40
codegen_flags: <defaults>
</compile_context>

<pallas_src>
import jax
import jax.numpy as jnp
from jax import lax
from jax.experimental import pallas as pl
from jax.experimental.pallas import tpu as pltpu

LANE = 128


def _round_up(x, m):
    return (x + m - 1) // m * m


# ----------------------------- fused Pallas kernel --------------------------

def _make_fused_kernel(s, Ho, Wo, Hp, Wp, CPI, CPO, has_downsample):
    """Builds the fused residual-block kernel for static shapes/stride."""
    taps = [(dy, dx) for dy in range(3) for dx in range(3)]

    def kernel(x_ref, w1_ref, b1_ref, w2_ref, b2_ref, *rest):
        if has_downsample:
            wd_ref, o_ref, y1pad_ref = rest
        else:
            o_ref, y1pad_ref = rest

        # ---- conv1: 3x3, stride s, pad 1 — in-kernel im2col (9 MXU matmuls) --
        # x_ref holds the space-to-depth ("phase") layout: row index
        # p*Hp + i with p = (dy%s)*s + (dx%s) selects xp[s*i+dy, s*j+dx].
        acc1 = jnp.zeros((Ho * Wo, CPO), jnp.float32)
        for t, (dy, dx) in enumerate(taps):
            p = (dy % s) * s + (dx % s)
            ay, ax = dy // s, dx // s
            xs = x_ref[0, p * Hp + ay: p * Hp + ay + Ho, ax: ax + Wo, :]
            acc1 = acc1 + jnp.dot(xs.reshape(Ho * Wo, CPI), w1_ref[t],
                                  preferred_element_type=jnp.float32)
        y1 = jnp.maximum(acc1 + b1_ref[...], 0.0)

        # Stage relu(conv1) in a zero-padded VMEM scratch — never leaves VMEM.
        y1pad_ref[...] = jnp.zeros_like(y1pad_ref)
        y1pad_ref[1: Ho + 1, 1: Wo + 1, :] = y1.reshape(Ho, Wo, CPO)

        # ---- conv2: 3x3, stride 1, pad 1 — in-kernel im2col over the scratch -
        acc2 = jnp.zeros((Ho * Wo, CPO), jnp.float32)
        for t, (dy, dx) in enumerate(taps):
            ys = y1pad_ref[dy: dy + Ho, dx: dx + Wo, :]
            acc2 = acc2 + jnp.dot(ys.reshape(Ho * Wo, CPO), w2_ref[t],
                                  preferred_element_type=jnp.float32)
        acc2 = acc2 + b2_ref[...]   # conv2 bias (+ folded downsample bias/BN)

        # ---- residual path: reuse the already-resident input tile ------------
        p_c = (1 % s) * s + (1 % s)          # center tap (dy=1, dx=1)
        a_c = 1 // s
        xc = x_ref[0, p_c * Hp + a_c: p_c * Hp + a_c + Ho, a_c: a_c + Wo, :]
        xc = xc.reshape(Ho * Wo, CPI)
        if has_downsample:
            # 1x1 stride-s conv with BatchNorm (eval mode) folded into wd/b2.
            acc2 = acc2 + jnp.dot(xc, wd_ref[...],
                                  preferred_element_type=jnp.float32)
        else:
            acc2 = acc2 + xc                 # plain residual add (CPI == CPO)

        o_ref[0] = jnp.maximum(acc2, 0.0).reshape(Ho, Wo, CPO).astype(o_ref.dtype)

    return kernel


# ----------------------------- forward wrapper ------------------------------

def residual_block_forward(x_nchw, params, stride):
    s = int(stride)
    x = jnp.transpose(x_nchw, (0, 2, 3, 1)).astype(jnp.float32)   # NCHW -> NHWC
    N, H, W, Cin = x.shape
    w1, b1, w2, b2 = params["w1"], params["b1"], params["w2"], params["b2"]
    Cout = w1.shape[0]
    has_downsample = (s != 1) or (Cin != Cout)

    Ho = (H + 2 - 3) // s + 1
    Wo = (W + 2 - 3) // s + 1
    halo = 2 // s                       # per-phase extra rows/cols for 3x3 taps
    Hp, Wp = Ho + halo, Wo + halo

    CPI = _round_up(Cin, LANE)          # lane-dense channel padding
    CPO = _round_up(Cout, LANE)

    # Input: lane-pad channels, zero-pad border (+alignment), space-to-depth by
    # stride so all in-kernel slices are unit-stride.  ~1x input bytes moved.
    xp = jnp.pad(x, ((0, 0), (1, s * Hp - H - 1), (1, s * Wp - W - 1),
                     (0, CPI - Cin)))
    xph = xp.reshape(N, Hp, s, Wp, s, CPI).transpose(0, 2, 4, 1, 3, 5)
    xph = xph.reshape(N, s * s * Hp, Wp, CPI)

    def _prep_w3x3(w, ci, co):
        # torch OIHW (co, ci, 3, 3) -> tap-major (9, ci_pad, co_pad)
        wt = jnp.transpose(w, (2, 3, 1, 0)).reshape(9, ci, co)
        out = jnp.zeros((9, _round_up(ci, LANE), _round_up(co, LANE)), jnp.float32)
        return out.at[:, :ci, :co].set(wt)

    w1_p = _prep_w3x3(w1, Cin, Cout)        # (9, CPI, CPO)
    w2_p = _prep_w3x3(w2, Cout, Cout)       # (9, CPO, CPO)
    b1_p = jnp.zeros((1, CPO), jnp.float32).at[0, :Cout].set(b1)

    if has_downsample:
        # TODO(synk): BatchNorm2d is folded in eval mode (running stats);
        # PyTorch training-mode batch statistics are not replicated.
        eps = 1e-5
        scale = params["bn_gamma"] / jnp.sqrt(params["bn_var"] + eps)
        shift = params["bn_beta"] - params["bn_mean"] * scale
        wd_eff = jnp.transpose(params["wd"][:, :, 0, 0], (1, 0)) * scale[None, :]
        bd_eff = params["bd"] * scale + shift
        wd_p = jnp.zeros((CPI, CPO), jnp.float32).at[:Cin, :Cout].set(wd_eff)
        b2_tot = b2 + bd_eff                 # fold downsample bias into conv2's
    else:
        wd_p = None
        b2_tot = b2
    b2_p = jnp.zeros((1, CPO), jnp.float32).at[0, :Cout].set(b2_tot)

    kernel = _make_fused_kernel(s, Ho, Wo, Hp, Wp, CPI, CPO, has_downsample)

    in_arrays = [xph, w1_p, b1_p, w2_p, b2_p]
    in_specs = [
        pl.BlockSpec((1, s * s * Hp, Wp, CPI), lambda n: (n, 0, 0, 0)),
        pl.BlockSpec((9, CPI, CPO), lambda n: (0, 0, 0)),
        pl.BlockSpec((1, CPO), lambda n: (0, 0)),
        pl.BlockSpec((9, CPO, CPO), lambda n: (0, 0, 0)),
        pl.BlockSpec((1, CPO), lambda n: (0, 0)),
    ]
    if has_downsample:
        in_arrays.append(wd_p)
        in_specs.append(pl.BlockSpec((CPI, CPO), lambda n: (0, 0)))

    out_p = pl.pallas_call(
        kernel,
        out_shape=jax.ShapeDtypeStruct((N, Ho, Wo, CPO), jnp.float32),
        grid=(N,),
        in_specs=in_specs,
        out_specs=pl.BlockSpec((1, Ho, Wo, CPO), lambda n: (n, 0, 0, 0)),
        scratch_shapes=[pltpu.VMEM((Ho + 2, Wo + 2, CPO), jnp.float32)],
        compiler_params=pltpu.CompilerParams(
            dimension_semantics=("parallel",)),
    )(*in_arrays)

    out = out_p[..., :Cout]                                   # drop lane padding
    return jnp.transpose(out, (0, 3, 1, 2))                   # NHWC -> NCHW


# ----------------------------- pure-JAX reference ---------------------------

def residual_block_reference(x_nchw, params, stride):
    x = jnp.transpose(x_nchw, (0, 2, 3, 1))

    def conv(z, w, b, s, pad):
        w_hwio = jnp.transpose(w, (2, 3, 1, 0))
        y = lax.conv_general_dilated(z, w_hwio, (s, s), [(pad, pad), (pad, pad)],
                                     dimension_numbers=("NHWC", "HWIO", "NHWC"))
        return y + b[None, None, None, :]

    out = jax.nn.relu(conv(x, params["w1"], params["b1"], stride, 1))
    out = conv(out, params["w2"], params["b2"], 1, 1)
    Cin = x.shape[-1]
    Cout = params["w1"].shape[0]
    if stride != 1 or Cin != Cout:
        ident = conv(x, params["wd"], params["bd"], stride, 0)
        scale = params["bn_gamma"] / jnp.sqrt(params["bn_var"] + 1e-5)
        ident = ident * scale + (params["bn_beta"] - params["bn_mean"] * scale)
    else:
        ident = x
    out = jax.nn.relu(out + ident)
    return jnp.transpose(out, (0, 3, 1, 2))


# ----------------------------- main -----------------------------------------

if __name__ == "__main__":
    def make_params(key, cin, cout, downsample):
        ks = jax.random.split(key, 10)
        p = {
            "w1": 0.1 * jax.random.normal(ks[0], (cout, cin, 3, 3), jnp.float32),
            "b1": 0.1 * jax.random.normal(ks[1], (cout,), jnp.float32),
            "w2": 0.1 * jax.random.normal(ks[2], (cout, cout, 3, 3), jnp.float32),
            "b2": 0.1 * jax.random.normal(ks[3], (cout,), jnp.float32),
        }
        if downsample:
            p.update({
                "wd": 0.1 * jax.random.normal(ks[4], (cout, cin, 1, 1), jnp.float32),
                "bd": 0.1 * jax.random.normal(ks[5], (cout,), jnp.float32),
                "bn_gamma": 1.0 + 0.1 * jax.random.normal(ks[6], (cout,), jnp.float32),
                "bn_beta": 0.1 * jax.random.normal(ks[7], (cout,), jnp.float32),
                "bn_mean": 0.1 * jax.random.normal(ks[8], (cout,), jnp.float32),
                "bn_var": 1.0 + 0.5 * jax.random.uniform(ks[9], (cout,), jnp.float32),
            })
        return p

    key = jax.random.PRNGKey(0)
    kp1, kp2, kx1, kx2 = jax.random.split(key, 4)

    # Case 1: stride-2 downsample block (Cin=4 -> Cout=8), spec input shape.
    N, Cin, Cout, H, W, stride = 2, 4, 8, 16, 16, 2
    params = make_params(kp1, Cin, Cout, True)
    x = jax.random.normal(kx1, (N, Cin, H, W), jnp.float32)
    out = jax.block_until_ready(residual_block_forward(x, params, stride))
    ref = jax.block_until_ready(residual_block_reference(x, params, stride))
    assert out.shape == ref.shape, (out.shape, ref.shape)
    assert jnp.allclose(out, ref, rtol=1e-4, atol=1e-4), \
        float(jnp.max(jnp.abs(out - ref)))

    # Case 2: stride-1 identity block (Cin == Cout = 8) — no downsample branch.
    params2 = make_params(kp2, 8, 8, False)
    x2 = jax.random.normal(kx2, (2, 8, 16, 16), jnp.float32)
    out2 = jax.block_until_ready(residual_block_forward(x2, params2, 1))
    ref2 = jax.block_until_ready(residual_block_reference(x2, params2, 1))
    assert out2.shape == ref2.shape, (out2.shape, ref2.shape)
    assert jnp.allclose(out2, ref2, rtol=1e-4, atol=1e-4), \
        float(jnp.max(jnp.abs(out2 - ref2)))

    print("KERNEL_OK")
</pallas_src>

<mosaic_0001>
module attributes {stable_mosaic.version = 11 : i64} {
  func.func @kernel(%arg0: i32, %arg1: memref<1x36x9x128xf32, #tpu.memory_space<vmem>>, %arg2: memref<9x128x128xf32, #tpu.memory_space<vmem>>, %arg3: memref<1x128xf32, #tpu.memory_space<vmem>>, %arg4: memref<9x128x128xf32, #tpu.memory_space<vmem>>, %arg5: memref<1x128xf32, #tpu.memory_space<vmem>>, %arg6: memref<128x128xf32, #tpu.memory_space<vmem>>, %arg7: memref<1x8x8x128xf32, #tpu.memory_space<vmem>>, %arg8: memref<10x10x128xf32, #tpu.memory_space<vmem>>) attributes {dimension_semantics = [#tpu.dimension_semantics<parallel>], iteration_bounds = array<i64: 2>, scalar_prefetch = 0 : i64, scratch_operands = 1 : i64, tpu.core_type = #tpu.core_type<tc>, window_params = [{transform_indices = @transform_0, window_bounds = array<i64: 1, 36, 9, 128>}, {pipeline_mode = #tpu.pipeline_mode<synchronous>, transform_indices = @transform_1, window_bounds = array<i64: 9, 128, 128>}, {pipeline_mode = #tpu.pipeline_mode<synchronous>, transform_indices = @transform_2, window_bounds = array<i64: 1, 128>}, {pipeline_mode = #tpu.pipeline_mode<synchronous>, transform_indices = @transform_3, window_bounds = array<i64: 9, 128, 128>}, {pipeline_mode = #tpu.pipeline_mode<synchronous>, transform_indices = @transform_4, window_bounds = array<i64: 1, 128>}, {pipeline_mode = #tpu.pipeline_mode<synchronous>, transform_indices = @transform_5, window_bounds = array<i64: 128, 128>}, {transform_indices = @transform_6, window_bounds = array<i64: 1, 8, 8, 128>}]} {
    %cst = arith.constant 0.000000e+00 : f32
    %0 = vector.broadcast %cst : f32 to vector<64x128xf32>
    %c0 = arith.constant 0 : index
    %c0_0 = arith.constant 0 : index
    %c0_1 = arith.constant 0 : index
    %c0_2 = arith.constant 0 : index
    %1 = vector.load %arg1[%c0, %c0_0, %c0_1, %c0_2] : memref<1x36x9x128xf32, #tpu.memory_space<vmem>>, vector<1x8x8x128xf32>
    %2 = vector.shape_cast %1 : vector<1x8x8x128xf32> to vector<8x8x128xf32>
    %3 = vector.shape_cast %2 : vector<8x8x128xf32> to vector<64x128xf32>
    %c0_3 = arith.constant 0 : index
    %c0_4 = arith.constant 0 : index
    %c0_5 = arith.constant 0 : index
    %4 = vector.load %arg2[%c0_3, %c0_4, %c0_5] : memref<9x128x128xf32, #tpu.memory_space<vmem>>, vector<1x128x128xf32>
    %5 = vector.shape_cast %4 : vector<1x128x128xf32> to vector<128x128xf32>
    %cst_6 = arith.constant dense<0.000000e+00> : vector<64x128xf32>
    %6 = tpu.matmul %3, %5, %cst_6 {dimension_numbers = #tpu.dot_dimension_numbers<[1], [0], [0], [1], [0, 0, 1, 1], [], []>} : vector<64x128xf32>, vector<128x128xf32>, vector<64x128xf32> -> vector<64x128xf32>
    %7 = arith.addf %0, %6 : vector<64x128xf32>
    %c0_7 = arith.constant 0 : index
    %c9 = arith.constant 9 : index
    %c0_8 = arith.constant 0 : index
    %c0_9 = arith.constant 0 : index
    %8 = vector.load %arg1[%c0_7, %c9, %c0_8, %c0_9] : memref<1x36x9x128xf32, #tpu.memory_space<vmem>>, vector<1x8x8x128xf32>
    %9 = vector.shape_cast %8 : vector<1x8x8x128xf32> to vector<8x8x128xf32>
    %10 = vector.shape_cast %9 : vector<8x8x128xf32> to vector<64x128xf32>
    %c1 = arith.constant 1 : index
    %c0_10 = arith.constant 0 : index
    %c0_11 = arith.constant 0 : index
    %11 = vector.load %arg2[%c1, %c0_10, %c0_11] : memref<9x128x128xf32, #tpu.memory_space<vmem>>, vector<1x128x128xf32>
    %12 = vector.shape_cast %11 : vector<1x128x128xf32> to vector<128x128xf32>
    %cst_12 = arith.constant dense<0.000000e+00> : vector<64x128xf32>
    %13 = tpu.matmul %10, %12, %cst_12 {dimension_numbers = #tpu.dot_dimension_numbers<[1], [0], [0], [1], [0, 0, 1, 1], [], []>} : vector<64x128xf32>, vector<128x128xf32>, vector<64x128xf32> -> vector<64x128xf32>
    %14 = arith.addf %7, %13 : vector<64x128xf32>
    %c0_13 = arith.constant 0 : index
    %c0_14 = arith.constant 0 : index
    %c1_15 = arith.constant 1 : index
    %c0_16 = arith.constant 0 : index
    %15 = vector.load %arg1[%c0_13, %c0_14, %c1_15, %c0_16] : memref<1x36x9x128xf32, #tpu.memory_space<vmem>>, vector<1x8x8x128xf32>
    %16 = vector.shape_cast %15 : vector<1x8x8x128xf32> to vector<8x8x128xf32>
    %17 = vector.shape_cast %16 : vector<8x8x128xf32> to vector<64x128xf32>
    %c2 = arith.constant 2 : index
    %c0_17 = arith.constant 0 : index
    %c0_18 = arith.constant 0 : index
    %18 = vector.load %arg2[%c2, %c0_17, %c0_18] : memref<9x128x128xf32, #tpu.memory_space<vmem>>, vector<1x128x128xf32>
    %19 = vector.shape_cast %18 : vector<1x128x128xf32> to vector<128x128xf32>
    %cst_19 = arith.constant dense<0.000000e+00> : vector<64x128xf32>
    %20 = tpu.matmul %17, %19, %cst_19 {dimension_numbers = #tpu.dot_dimension_numbers<[1], [0], [0], [1], [0, 0, 1, 1], [], []>} : vector<64x128xf32>, vector<128x128xf32>, vector<64x128xf32> -> vector<64x128xf32>
    %21 = arith.addf %14, %20 : vector<64x128xf32>
    %c0_20 = arith.constant 0 : index
    %c18 = arith.constant 18 : index
    %c0_21 = arith.constant 0 : index
    %c0_22 = arith.constant 0 : index
    %22 = vector.load %arg1[%c0_20, %c18, %c0_21, %c0_22] : memref<1x36x9x128xf32, #tpu.memory_space<vmem>>, vector<1x8x8x128xf32>
    %23 = vector.shape_cast %22 : vector<1x8x8x128xf32> to vector<8x8x128xf32>
    %24 = vector.shape_cast %23 : vector<8x8x128xf32> to vector<64x128xf32>
    %c3 = arith.constant 3 : index
    %c0_23 = arith.constant 0 : index
    %c0_24 = arith.constant 0 : index
    %25 = vector.load %arg2[%c3, %c0_23, %c0_24] : memref<9x128x128xf32, #tpu.memory_space<vmem>>, vector<1x128x128xf32>
    %26 = vector.shape_cast %25 : vector<1x128x128xf32> to vector<128x128xf32>
    %cst_25 = arith.constant dense<0.000000e+00> : vector<64x128xf32>
    %27 = tpu.matmul %24, %26, %cst_25 {dimension_numbers = #tpu.dot_dimension_numbers<[1], [0], [0], [1], [0, 0, 1, 1], [], []>} : vector<64x128xf32>, vector<128x128xf32>, vector<64x128xf32> -> vector<64x128xf32>
    %28 = arith.addf %21, %27 : vector<64x128xf32>
    %c0_26 = arith.constant 0 : index
    %c27 = arith.constant 27 : index
    %c0_27 = arith.constant 0 : index
    %c0_28 = arith.constant 0 : index
    %29 = vector.load %arg1[%c0_26, %c27, %c0_27, %c0_28] : memref<1x36x9x128xf32, #tpu.memory_space<vmem>>, vector<1x8x8x128xf32>
    %30 = vector.shape_cast %29 : vector<1x8x8x128xf32> to vector<8x8x128xf32>
    %31 = vector.shape_cast %30 : vector<8x8x128xf32> to vector<64x128xf32>
    %c4 = arith.constant 4 : index
    %c0_29 = arith.constant 0 : index
    %c0_30 = arith.constant 0 : index
    %32 = vector.load %arg2[%c4, %c0_29, %c0_30] : memref<9x128x128xf32, #tpu.memory_space<vmem>>, vector<1x128x128xf32>
    %33 = vector.shape_cast %32 : vector<1x128x128xf32> to vector<128x128xf32>
    %cst_31 = arith.constant dense<0.000000e+00> : vector<64x128xf32>
    %34 = tpu.matmul %31, %33, %cst_31 {dimension_numbers = #tpu.dot_dimension_numbers<[1], [0], [0], [1], [0, 0, 1, 1], [], []>} : vector<64x128xf32>, vector<128x128xf32>, vector<64x128xf32> -> vector<64x128xf32>
    %35 = arith.addf %28, %34 : vector<64x128xf32>
    %c0_32 = arith.constant 0 : index
    %c18_33 = arith.constant 18 : index
    %c1_34 = arith.constant 1 : index
    %c0_35 = arith.constant 0 : index
    %36 = vector.load %arg1[%c0_32, %c18_33, %c1_34, %c0_35] : memref<1x36x9x128xf32, #tpu.memory_space<vmem>>, vector<1x8x8x128xf32>
    %37 = vector.shape_cast %36 : vector<1x8x8x128xf32> to vector<8x8x128xf32>
    %38 = vector.shape_cast %37 : vector<8x8x128xf32> to vector<64x128xf32>
    %c5 = arith.constant 5 : index
    %c0_36 = arith.constant 0 : index
    %c0_37 = arith.constant 0 : index
    %39 = vector.load %arg2[%c5, %c0_36, %c0_37] : memref<9x128x128xf32, #tpu.memory_space<vmem>>, vector<1x128x128xf32>
    %40 = vector.shape_cast %39 : vector<1x128x128xf32> to vector<128x128xf32>
    %cst_38 = arith.constant dense<0.000000e+00> : vector<64x128xf32>
    %41 = tpu.matmul %38, %40, %cst_38 {dimension_numbers = #tpu.dot_dimension_numbers<[1], [0], [0], [1], [0, 0, 1, 1], [], []>} : vector<64x128xf32>, vector<128x128xf32>, vector<64x128xf32> -> vector<64x128xf32>
    %42 = arith.addf %35, %41 : vector<64x128xf32>
    %c0_39 = arith.constant 0 : index
    %c1_40 = arith.constant 1 : index
    %c0_41 = arith.constant 0 : index
    %c0_42 = arith.constant 0 : index
    %43 = vector.load %arg1[%c0_39, %c1_40, %c0_41, %c0_42] : memref<1x36x9x128xf32, #tpu.memory_space<vmem>>, vector<1x8x8x128xf32>
    %44 = vector.shape_cast %43 : vector<1x8x8x128xf32> to vector<8x8x128xf32>
    %45 = vector.shape_cast %44 : vector<8x8x128xf32> to vector<64x128xf32>
    %c6 = arith.constant 6 : index
    %c0_43 = arith.constant 0 : index
    %c0_44 = arith.constant 0 : index
    %46 = vector.load %arg2[%c6, %c0_43, %c0_44] : memref<9x128x128xf32, #tpu.memory_space<vmem>>, vector<1x128x128xf32>
    %47 = vector.shape_cast %46 : vector<1x128x128xf32> to vector<128x128xf32>
    %cst_45 = arith.constant dense<0.000000e+00> : vector<64x128xf32>
    %48 = tpu.matmul %45, %47, %cst_45 {dimension_numbers = #tpu.dot_dimension_numbers<[1], [0], [0], [1], [0, 0, 1, 1], [], []>} : vector<64x128xf32>, vector<128x128xf32>, vector<64x128xf32> -> vector<64x128xf32>
    %49 = arith.addf %42, %48 : vector<64x128xf32>
    %c0_46 = arith.constant 0 : index
    %c10 = arith.constant 10 : index
    %c0_47 = arith.constant 0 : index
    %c0_48 = arith.constant 0 : index
    %50 = vector.load %arg1[%c0_46, %c10, %c0_47, %c0_48] : memref<1x36x9x128xf32, #tpu.memory_space<vmem>>, vector<1x8x8x128xf32>
    %51 = vector.shape_cast %50 : vector<1x8x8x128xf32> to vector<8x8x128xf32>
    %52 = vector.shape_cast %51 : vector<8x8x128xf32> to vector<64x128xf32>
    %c7 = arith.constant 7 : index
    %c0_49 = arith.constant 0 : index
    %c0_50 = arith.constant 0 : index
    %53 = vector.load %arg2[%c7, %c0_49, %c0_50] : memref<9x128x128xf32, #tpu.memory_space<vmem>>, vector<1x128x128xf32>
    %54 = vector.shape_cast %53 : vector<1x128x128xf32> to vector<128x128xf32>
    %cst_51 = arith.constant dense<0.000000e+00> : vector<64x128xf32>
    %55 = tpu.matmul %52, %54, %cst_51 {dimension_numbers = #tpu.dot_dimension_numbers<[1], [0], [0], [1], [0, 0, 1, 1], [], []>} : vector<64x128xf32>, vector<128x128xf32>, vector<64x128xf32> -> vector<64x128xf32>
    %56 = arith.addf %49, %55 : vector<64x128xf32>
    %c0_52 = arith.constant 0 : index
    %c1_53 = arith.constant 1 : index
    %c1_54 = arith.constant 1 : index
    %c0_55 = arith.constant 0 : index
    %57 = vector.load %arg1[%c0_52, %c1_53, %c1_54, %c0_55] : memref<1x36x9x128xf32, #tpu.memory_space<vmem>>, vector<1x8x8x128xf32>
    %58 = vector.shape_cast %57 : vector<1x8x8x128xf32> to vector<8x8x128xf32>
    %59 = vector.shape_cast %58 : vector<8x8x128xf32> to vector<64x128xf32>
    %c8 = arith.constant 8 : index
    %c0_56 = arith.constant 0 : index
    %c0_57 = arith.constant 0 : index
    %60 = vector.load %arg2[%c8, %c0_56, %c0_57] : memref<9x128x128xf32, #tpu.memory_space<vmem>>, vector<1x128x128xf32>
    %61 = vector.shape_cast %60 : vector<1x128x128xf32> to vector<128x128xf32>
    %cst_58 = arith.constant dense<0.000000e+00> : vector<64x128xf32>
    %62 = tpu.matmul %59, %61, %cst_58 {dimension_numbers = #tpu.dot_dimension_numbers<[1], [0], [0], [1], [0, 0, 1, 1], [], []>} : vector<64x128xf32>, vector<128x128xf32>, vector<64x128xf32> -> vector<64x128xf32>
    %63 = arith.addf %56, %62 : vector<64x128xf32>
    %c0_59 = arith.constant 0 : index
    %c0_60 = arith.constant 0 : index
    %64 = vector.load %arg3[%c0_59, %c0_60] : memref<1x128xf32, #tpu.memory_space<vmem>>, vector<1x128xf32>
    %65 = vector.broadcast %64 : vector<1x128xf32> to vector<64x128xf32>
    %66 = arith.addf %63, %65 : vector<64x128xf32>
    %cst_61 = arith.constant 0.000000e+00 : f32
    %67 = vector.broadcast %cst_61 : f32 to vector<64x128xf32>
    %68 = arith.maximumf %66, %67 : vector<64x128xf32>
    %cst_62 = arith.constant 0.000000e+00 : f32
    %69 = vector.broadcast %cst_62 : f32 to vector<10x10x128xf32>
    %c0_63 = arith.constant 0 : index
    %c0_64 = arith.constant 0 : index
    %c0_65 = arith.constant 0 : index
    %70 = vector.load %arg8[%c0_63, %c0_64, %c0_65] : memref<10x10x128xf32, #tpu.memory_space<vmem>>, vector<10x10x128xf32>
    tpu.vector_store %arg8[%c0_63, %c0_64, %c0_65], %69 {strides = array<i32>} : memref<10x10x128xf32, #tpu.memory_space<vmem>>, vector<10x10x128xf32>,
    %71 = vector.shape_cast %68 : vector<64x128xf32> to vector<8x8x128xf32>
    %c1_66 = arith.constant 1 : index
    %c1_67 = arith.constant 1 : index
    %c0_68 = arith.constant 0 : index
    %72 = vector.load %arg8[%c1_66, %c1_67, %c0_68] : memref<10x10x128xf32, #tpu.memory_space<vmem>>, vector<8x8x128xf32>
    tpu.vector_store %arg8[%c1_66, %c1_67, %c0_68], %71 {strides = array<i32>} : memref<10x10x128xf32, #tpu.memory_space<vmem>>, vector<8x8x128xf32>,
    %cst_69 = arith.constant 0.000000e+00 : f32
    %73 = vector.broadcast %cst_69 : f32 to vector<64x128xf32>
    %c0_70 = arith.constant 0 : index
    %c0_71 = arith.constant 0 : index
    %c0_72 = arith.constant 0 : index
    %74 = vector.load %arg8[%c0_70, %c0_71, %c0_72] : memref<10x10x128xf32, #tpu.memory_space<vmem>>, vector<8x8x128xf32>
    %75 = vector.shape_cast %74 : vector<8x8x128xf32> to vector<64x128xf32>
    %c0_73 = arith.constant 0 : index
    %c0_74 = arith.constant 0 : index
    %c0_75 = arith.constant 0 : index
    %76 = vector.load %arg4[%c0_73, %c0_74, %c0_75] : memref<9x128x128xf32, #tpu.memory_space<vmem>>, vector<1x128x128xf32>
    %77 = vector.shape_cast %76 : vector<1x128x128xf32> to vector<128x128xf32>
    %cst_76 = arith.constant dense<0.000000e+00> : vector<64x128xf32>
    %78 = tpu.matmul %75, %77, %cst_76 {dimension_numbers = #tpu.dot_dimension_numbers<[1], [0], [0], [1], [0, 0, 1, 1], [], []>} : vector<64x128xf32>, vector<128x128xf32>, vector<64x128xf32> -> vector<64x128xf32>
    %79 = arith.addf %73, %78 : vector<64x128xf32>
    %c0_77 = arith.constant 0 : index
    %c1_78 = arith.constant 1 : index
    %c0_79 = arith.constant 0 : index
    %80 = vector.load %arg8[%c0_77, %c1_78, %c0_79] : memref<10x10x128xf32, #tpu.memory_space<vmem>>, vector<8x8x128xf32>
    %81 = vector.shape_cast %80 : vector<8x8x128xf32> to vector<64x128xf32>
    %c1_80 = arith.constant 1 : index
    %c0_81 = arith.constant 0 : index
    %c0_82 = arith.constant 0 : index
    %82 = vector.load %arg4[%c1_80, %c0_81, %c0_82] : memref<9x128x128xf32, #tpu.memory_space<vmem>>, vector<1x128x128xf32>
    %83 = vector.shape_cast %82 : vector<1x128x128xf32> to vector<128x128xf32>
    %cst_83 = arith.constant dense<0.000000e+00> : vector<64x128xf32>
    %84 = tpu.matmul %81, %83, %cst_83 {dimension_numbers = #tpu.dot_dimension_numbers<[1], [0], [0], [1], [0, 0, 1, 1], [], []>} : vector<64x128xf32>, vector<128x128xf32>, vector<64x128xf32> -> vector<64x128xf32>
    %85 = arith.addf %79, %84 : vector<64x128xf32>
    %c0_84 = arith.constant 0 : index
    %c2_85 = arith.constant 2 : index
    %c0_86 = arith.constant 0 : index
    %86 = vector.load %arg8[%c0_84, %c2_85, %c0_86] : memref<10x10x128xf32, #tpu.memory_space<vmem>>, vector<8x8x128xf32>
    %87 = vector.shape_cast %86 : vector<8x8x128xf32> to vector<64x128xf32>
    %c2_87 = arith.constant 2 : index
    %c0_88 = arith.constant 0 : index
    %c0_89 = arith.constant 0 : index
    %88 = vector.load %arg4[%c2_87, %c0_88, %c0_89] : memref<9x128x128xf32, #tpu.memory_space<vmem>>, vector<1x128x128xf32>
    %89 = vector.shape_cast %88 : vector<1x128x128xf32> to vector<128x128xf32>
    %cst_90 = arith.constant dense<0.000000e+00> : vector<64x128xf32>
    %90 = tpu.matmul %87, %89, %cst_90 {dimension_numbers = #tpu.dot_dimension_numbers<[1], [0], [0], [1], [0, 0, 1, 1], [], []>} : vector<64x128xf32>, vector<128x128xf32>, vector<64x128xf32> -> vector<64x128xf32>
    %91 = arith.addf %85, %90 : vector<64x128xf32>
    %c1_91 = arith.constant 1 : index
    %c0_92 = arith.constant 0 : index
    %c0_93 = arith.constant 0 : index
    %92 = vector.load %arg8[%c1_91, %c0_92, %c0_93] : memref<10x10x128xf32, #tpu.memory_space<vmem>>, vector<8x8x128xf32>
    %93 = vector.shape_cast %92 : vector<8x8x128xf32> to vector<64x128xf32>
    %c3_94 = arith.constant 3 : index
    %c0_95 = arith.constant 0 : index
    %c0_96 = arith.constant 0 : index
    %94 = vector.load %arg4[%c3_94, %c0_95, %c0_96] : memref<9x128x128xf32, #tpu.memory_space<vmem>>, vector<1x128x128xf32>
    %95 = vector.shape_cast %94 : vector<1x128x128xf32> to vector<128x128xf32>
    %cst_97 = arith.constant dense<0.000000e+00> : vector<64x128xf32>
    %96 = tpu.matmul %93, %95, %cst_97 {dimension_numbers = #tpu.dot_dimension_numbers<[1], [0], [0], [1], [0, 0, 1, 1], [], []>} : vector<64x128xf32>, vector<128x128xf32>, vector<64x128xf32> -> vector<64x128xf32>
    %97 = arith.addf %91, %96 : vector<64x128xf32>
    %c1_98 = arith.constant 1 : index
    %c1_99 = arith.constant 1 : index
    %c0_100 = arith.constant 0 : index
    %98 = vector.load %arg8[%c1_98, %c1_99, %c0_100] : memref<10x10x128xf32, #tpu.memory_space<vmem>>, vector<8x8x128xf32>
    %99 = vector.shape_cast %98 : vector<8x8x128xf32> to vector<64x128xf32>
    %c4_101 = arith.constant 4 : index
    %c0_102 = arith.constant 0 : index
    %c0_103 = arith.constant 0 : index
    %100 = vector.load %arg4[%c4_101, %c0_102, %c0_103] : memref<9x128x128xf32, #tpu.memory_space<vmem>>, vector<1x128x128xf32>
    %101 = vector.shape_cast %100 : vector<1x128x128xf32> to vector<128x128xf32>
    %cst_104 = arith.constant dense<0.000000e+00> : vector<64x128xf32>
    %102 = tpu.matmul %99, %101, %cst_104 {dimension_numbers = #tpu.dot_dimension_numbers<[1], [0], [0], [1], [0, 0, 1, 1], [], []>} : vector<64x128xf32>, vector<128x128xf32>, vector<64x128xf32> -> vector<64x128xf32>
    %103 = arith.addf %97, %102 : vector<64x128xf32>
    %c1_105 = arith.constant 1 : index
    %c2_106 = arith.constant 2 : index
    %c0_107 = arith.constant 0 : index
    %104 = vector.load %arg8[%c1_105, %c2_106, %c0_107] : memref<10x10x128xf32, #tpu.memory_space<vmem>>, vector<8x8x128xf32>
    %105 = vector.shape_cast %104 : vector<8x8x128xf32> to vector<64x128xf32>
    %c5_108 = arith.constant 5 : index
    %c0_109 = arith.constant 0 : index
    %c0_110 = arith.constant 0 : index
    %106 = vector.load %arg4[%c5_108, %c0_109, %c0_110] : memref<9x128x128xf32, #tpu.memory_space<vmem>>, vector<1x128x128xf32>
    %107 = vector.shape_cast %106 : vector<1x128x128xf32> to vector<128x128xf32>
    %cst_111 = arith.constant dense<0.000000e+00> : vector<64x128xf32>
    %108 = tpu.matmul %105, %107, %cst_111 {dimension_numbers = #tpu.dot_dimension_numbers<[1], [0], [0], [1], [0, 0, 1, 1], [], []>} : vector<64x128xf32>, vector<128x128xf32>, vector<64x128xf32> -> vector<64x128xf32>
    %109 = arith.addf %103, %108 : vector<64x128xf32>
    %c2_112 = arith.constant 2 : index
    %c0_113 = arith.constant 0 : index
    %c0_114 = arith.constant 0 : index
    %110 = vector.load %arg8[%c2_112, %c0_113, %c0_114] : memref<10x10x128xf32, #tpu.memory_space<vmem>>, vector<8x8x128xf32>
    %111 = vector.shape_cast %110 : vector<8x8x128xf32> to vector<64x128xf32>
    %c6_115 = arith.constant 6 : index
    %c0_116 = arith.constant 0 : index
    %c0_117 = arith.constant 0 : index
    %112 = vector.load %arg4[%c6_115, %c0_116, %c0_117] : memref<9x128x128xf32, #tpu.memory_space<vmem>>, vector<1x128x128xf32>
    %113 = vector.shape_cast %112 : vector<1x128x128xf32> to vector<128x128xf32>
    %cst_118 = arith.constant dense<0.000000e+00> : vector<64x128xf32>
    %114 = tpu.matmul %111, %113, %cst_118 {dimension_numbers = #tpu.dot_dimension_numbers<[1], [0], [0], [1], [0, 0, 1, 1], [], []>} : vector<64x128xf32>, vector<128x128xf32>, vector<64x128xf32> -> vector<64x128xf32>
    %115 = arith.addf %109, %114 : vector<64x128xf32>
    %c2_119 = arith.constant 2 : index
    %c1_120 = arith.constant 1 : index
    %c0_121 = arith.constant 0 : index
    %116 = vector.load %arg8[%c2_119, %c1_120, %c0_121] : memref<10x10x128xf32, #tpu.memory_space<vmem>>, vector<8x8x128xf32>
    %117 = vector.shape_cast %116 : vector<8x8x128xf32> to vector<64x128xf32>
    %c7_122 = arith.constant 7 : index
    %c0_123 = arith.constant 0 : index
    %c0_124 = arith.constant 0 : index
    %118 = vector.load %arg4[%c7_122, %c0_123, %c0_124] : memref<9x128x128xf32, #tpu.memory_space<vmem>>, vector<1x128x128xf32>
    %119 = vector.shape_cast %118 : vector<1x128x128xf32> to vector<128x128xf32>
    %cst_125 = arith.constant dense<0.000000e+00> : vector<64x128xf32>
    %120 = tpu.matmul %117, %119, %cst_125 {dimension_numbers = #tpu.dot_dimension_numbers<[1], [0], [0], [1], [0, 0, 1, 1], [], []>} : vector<64x128xf32>, vector<128x128xf32>, vector<64x128xf32> -> vector<64x128xf32>
    %121 = arith.addf %115, %120 : vector<64x128xf32>
    %c2_126 = arith.constant 2 : index
    %c2_127 = arith.constant 2 : index
    %c0_128 = arith.constant 0 : index
    %122 = vector.load %arg8[%c2_126, %c2_127, %c0_128] : memref<10x10x128xf32, #tpu.memory_space<vmem>>, vector<8x8x128xf32>
    %123 = vector.shape_cast %122 : vector<8x8x128xf32> to vector<64x128xf32>
    %c8_129 = arith.constant 8 : index
    %c0_130 = arith.constant 0 : index
    %c0_131 = arith.constant 0 : index
    %124 = vector.load %arg4[%c8_129, %c0_130, %c0_131] : memref<9x128x128xf32, #tpu.memory_space<vmem>>, vector<1x128x128xf32>
    %125 = vector.shape_cast %124 : vector<1x128x128xf32> to vector<128x128xf32>
    %cst_132 = arith.constant dense<0.000000e+00> : vector<64x128xf32>
    %126 = tpu.matmul %123, %125, %cst_132 {dimension_numbers = #tpu.dot_dimension_numbers<[1], [0], [0], [1], [0, 0, 1, 1], [], []>} : vector<64x128xf32>, vector<128x128xf32>, vector<64x128xf32> -> vector<64x128xf32>
    %127 = arith.addf %121, %126 : vector<64x128xf32>
    %c0_133 = arith.constant 0 : index
    %c0_134 = arith.constant 0 : index
    %128 = vector.load %arg5[%c0_133, %c0_134] : memref<1x128xf32, #tpu.memory_space<vmem>>, vector<1x128xf32>
    %129 = vector.broadcast %128 : vector<1x128xf32> to vector<64x128xf32>
    %130 = arith.addf %127, %129 : vector<64x128xf32>
    %c0_135 = arith.constant 0 : index
    %c27_136 = arith.constant 27 : index
    %c0_137 = arith.constant 0 : index
    %c0_138 = arith.constant 0 : index
    %131 = vector.load %arg1[%c0_135, %c27_136, %c0_137, %c0_138] : memref<1x36x9x128xf32, #tpu.memory_space<vmem>>, vector<1x8x8x128xf32>
    %132 = vector.shape_cast %131 : vector<1x8x8x128xf32> to vector<8x8x128xf32>
    %133 = vector.shape_cast %132 : vector<8x8x128xf32> to vector<64x128xf32>
    %c0_139 = arith.constant 0 : index
    %c0_140 = arith.constant 0 : index
    %134 = vector.load %arg6[%c0_139, %c0_140] : memref<128x128xf32, #tpu.memory_space<vmem>>, vector<128x128xf32>
    %cst_141 = arith.constant dense<0.000000e+00> : vector<64x128xf32>
    %135 = tpu.matmul %133, %134, %cst_141 {dimension_numbers = #tpu.dot_dimension_numbers<[1], [0], [0], [1], [0, 0, 1, 1], [], []>} : vector<64x128xf32>, vector<128x128xf32>, vector<64x128xf32> -> vector<64x128xf32>
    %136 = arith.addf %130, %135 : vector<64x128xf32>
    %cst_142 = arith.constant 0.000000e+00 : f32
    %137 = vector.broadcast %cst_142 : f32 to vector<64x128xf32>
    %138 = arith.maximumf %136, %137 : vector<64x128xf32>
    %139 = vector.shape_cast %138 : vector<64x128xf32> to vector<8x8x128xf32>
    %c0_143 = arith.constant 0 : index
    %c0_144 = arith.constant 0 : index
    %c0_145 = arith.constant 0 : index
    %c0_146 = arith.constant 0 : index
    %140 = vector.load %arg7[%c0_143, %c0_144, %c0_145, %c0_146] : memref<1x8x8x128xf32, #tpu.memory_space<vmem>>, vector<1x8x8x128xf32>
    %141 = vector.shape_cast %140 : vector<1x8x8x128xf32> to vector<8x8x128xf32>
    %142 = vector.shape_cast %139 : vector<8x8x128xf32> to vector<1x8x8x128xf32>
    tpu.vector_store %arg7[%c0_143, %c0_144, %c0_145, %c0_146], %142 {strides = array<i32>} : memref<1x8x8x128xf32, #tpu.memory_space<vmem>>, vector<1x8x8x128xf32>,
    return
  }
  func.func @transform_0(%arg0: i32) -> (i32, i32, i32, i32) {
    %c0_i32 = arith.constant 0 : i32
    %c0_i32_0 = arith.constant 0 : i32
    %c0_i32_1 = arith.constant 0 : i32
    %c0_i32_2 = arith.constant 0 : i32
    return %arg0, %c0_i32, %c0_i32_0, %c0_i32_1 : i32, i32, i32, i32
  }
  func.func @transform_1(%arg0: i32) -> (i32, i32, i32) {
    %c0_i32 = arith.constant 0 : i32
    %c0_i32_0 = arith.constant 0 : i32
    %c0_i32_1 = arith.constant 0 : i32
    %c0_i32_2 = arith.constant 0 : i32
    return %c0_i32, %c0_i32_0, %c0_i32_1 : i32, i32, i32
  }
  func.func @transform_2(%arg0: i32) -> (i32, i32) {
    %c0_i32 = arith.constant 0 : i32
    %c0_i32_0 = arith.constant 0 : i32
    %c0_i32_1 = arith.constant 0 : i32
    return %c0_i32, %c0_i32_0 : i32, i32
  }
  func.func @transform_3(%arg0: i32) -> (i32, i32, i32) {
    %c0_i32 = arith.constant 0 : i32
    %c0_i32_0 = arith.constant 0 : i32
    %c0_i32_1 = arith.constant 0 : i32
    %c0_i32_2 = arith.constant 0 : i32
    return %c0_i32, %c0_i32_0, %c0_i32_1 : i32, i32, i32
  }
  func.func @transform_4(%arg0: i32) -> (i32, i32) {
    %c0_i32 = arith.constant 0 : i32
    %c0_i32_0 = arith.constant 0 : i32
    %c0_i32_1 = arith.constant 0 : i32
    return %c0_i32, %c0_i32_0 : i32, i32
  }
  func.func @transform_5(%arg0: i32) -> (i32, i32) {
    %c0_i32 = arith.constant 0 : i32
    %c0_i32_0 = arith.constant 0 : i32
    %c0_i32_1 = arith.constant 0 : i32
    return %c0_i32, %c0_i32_0 : i32, i32
  }
  func.func @transform_6(%arg0: i32) -> (i32, i32, i32, i32) {
    %c0_i32 = arith.constant 0 : i32
    %c0_i32_0 = arith.constant 0 : i32
    %c0_i32_1 = arith.constant 0 : i32
    %c0_i32_2 = arith.constant 0 : i32
    return %arg0, %c0_i32, %c0_i32_0, %c0_i32_1 : i32, i32, i32, i32
  }
}

</mosaic_0001>

<bundles_post_ra>
// kernel: tpu_custom_call.1
= control target key start
LH: loop header
LB: loop body
LE: loop exit
PB: predicated region body
PF: predicated region fallthrough
CT: control target
= control target key end

     0   :  { %11 = vsyncpa [#allocation4], 0  ;;  %s6456_s0 = inlined_call_operand.vmem [shape: f32[2,36,9,128], index: 0, kind: input, shape index: {}]   ;;  %s6457_s1 = inlined_call_operand.vmem [shape: f32[9,128,128], index: 1, kind: input, shape index: {}]   ;;  %s6458_s2 = inlined_call_operand.vmem [shape: f32[1,128], index: 2, kind: input, shape index: {}]   ;;  %s6459_s3 = inlined_call_operand.hbm [shape: f32[9,128,128], index: 3, kind: input, shape index: {}]   ;;  %s6460_s4 = inlined_call_operand.vmem [shape: f32[1,128], index: 4, kind: input, shape index: {}]   ;;  %s6461_s5 = inlined_call_operand.vmem [shape: f32[128,128], index: 5, kind: input, shape index: {}]   ;;  %s6462_s6 = inlined_call_operand.hbm [shape: f32[2,8,8,128], index: 6, kind: output, shape index: {}]  }
   0x1   :  { %12 = vsyncpa [#allocation5], 0 }
   0x2   :  { %14 = vsyncpa [#allocation5 + $0x1], 0  ;;  %s5491_s21 = smov 0   ;;  %s5493_s22 = smov 0  }
   0x3   :  { %s5495_s23 = smov 0   ;;  %s5497_s24 = smov 0  }
   0x4 LB: > { %s5512_s25 = sadd.s32 4294967295, %s5447_s24   ;;  %s3029_s26 = sadd.s32 4294967294, %s5447_s24   ;;  %s5447_s24 = sphi %s5497_s24, %s6478_s24   ;;  %s5443_s23 = sphi %s5495_s23, %s6477_s23   ;;  %s5439_s22 = sphi %s5493_s22, %s6476_s22   ;;  %s5435_s21 = sphi %s5491_s21, %s6475_s21  }
   0x5   : > { %s5516_s27 = sadd.s32 1, %s5447_s24   ;;  %s158_s28 = sadd.s32 1, %s5443_s23 }
   0x6   : > { %s155_s29 = ssub.s32 %s5447_s24, %s5516_s27  ;;  %p168_p0 = scmp.ne.s32.totalorder %s5443_s23, %s5439_s22 }
   0x7   : > { %p156_p1 = scmp.eq.s32.totalorder %s155_s29, 0  ;;  %p169_p2 = scmp.eq.s32.totalorder %s5512_s25, 1 }
   0x8   : > { %p174_p3 = scmp.ne.s32.totalorder %s5439_s22, %s5435_s21  ;;  %p175_p4 = scmp.eq.s32.totalorder %s3029_s26, 1 }
   0x9   : > { %s5527_s30 = scalar_select %p156_p1, %s5443_s23, %s158_s28  }
   0xa   : > { %p5529_p5 = por %p169_p2, %p168_p0  ;;  %p5533_p6 = por %p175_p4, %p174_p3 }
   0xb   : > { %p3030_p7 = scmp.ge.s32.totalorder %s5447_s24, 1  ;;  %p182_p8 = scmp.lt.s32.totalorder %s5447_s24, 3 }
   0xc   : > { %s6466_s7 = scalar_select %p5529_p5, 1, 0 }
   0xd   : > { %s6467_s8 = scalar_select %p5533_p6, 1, 0 }
   0xe   : > { %p6463_p9 = scmp.eq.s32.totalorder %s5512_s25, 0  ;;  %p5540_p10 = pnand %p3030_p7, %p182_p8 }
   0xf   : > { %s5449_s10 = smov [#allocation3]   ;;  %s5353_s15 = scalar_lea.hbm %s6459_s3, 18432 }
  0x10   : > { %s6468_s9 = scalar_select %p5540_p10, 1, 0 }
  0x11   : > { %s200_s11 = sshll.u32 %s5449_s10, 4  ;;  %p5304_p11 = pneg %p5540_p10  ;;  %s201_s11 = int_to_ptr.vmem [resolvable:$true] %s200_s11 }
  0x12   : > { %p5354_p13 = scmp.ne.s32.totalorder %s6459_s3, %s5353_s15  ;;  %p5360_p3 = scmp.lt.u32.totalorder %s5353_s15, %s6459_s3 }
  0x13   : > { %p5548_p12 = pnand %p6463_p9, %p5304_p11 }
  0x15   : > { %p5355_p0 = pneg %p5548_p12 }
  0x17   : > { %p5356_p1 = pnand %p5355_p0, %p5354_p13 }
  0x19   : > { %p5357_p2 = pneg %p5356_p1 }
  0x1b   : > { %p5362_p4 = pnand %p5360_p3, %p5357_p2 }
  0x1d   : > { %5365 = shalt.err (!%p5362_p4)
}
  0x1e   : > { %s5366_s20 = scalar_lea.vmem %s201_s11, 18432  ;;  %p5374_p9 = scmp.lt.s32.totalorder %s201_s11, %s201_s11 }
  0x1f   : > { %p5367_p7 = scmp.ne.s32.totalorder %s201_s11, %s5366_s20  ;;  %p5375_p6 = scmp.lt.s32.totalorder %s5366_s20, %s5366_s20 }
  0x21   : > { %p5369_p8 = pnand %p5367_p7, %p5355_p0  ;;  %p5376_p5 = por %p5375_p6, %p5374_p9 }
  0x23   : > { %p5370_p11 = pneg %p5369_p8 }
  0x25   : > { %p5377_p10 = pnand %p5376_p5, %p5370_p11 }
  0x27   : > { %5380 = shalt.err (!%p5377_p10)
}
  0x28   : > { %s5450_s26 = smov 128   ;;  %s5451_s28 = smov 8  }
  0x29   : > { %5307 = dma.hbm_to_vmem [thread:$0]  (!%p5548_p12), %s6459_s3, 18432, %s201_s11, [#allocation4], %s5450_s26, %s5450_s26, %s5451_s28  }
  0x2a   : > { %p6470_p13 = scmp.ne.s32.totalorder %s6468_s9, 0 }
  0x2b   : > { %p6471_p1 = scmp.eq.s32.totalorder (!%p6470_p13), %s5512_s25, 0 }
  0x2c   : > { %230 = sbr.rel (%p6470_p13) target bundleno = 1084 (0x43c), region = 44 }
  0x33   : > { %5426 = dma.done.wait (%p6471_p1), [#allocation4], 18432   ;;  %p6472_p0 = pmov %p6471_p1 }
  0x34   : > { %p260_p5 = scmp.lt.s32.totalorder %s5512_s25, 1  ;;  %v3045_v0 = vld [vmem:[%s6457_s1 + $0x80] sm:$0xff]  ;;  %v3046_v1 = vld [vmem:[%s6457_s1 + $0x88] sm:$0xff]  ;;  %v3047_v2 = vld [vmem:[%s6457_s1 + $0x90] sm:$0xff]  ;;  %s3236_s19 = sshll.u32 %s5512_s25, 10 }
  0x35   : > { %5428 = vsyncadd (%p6472_p0), [#allocation4], 4294948864  ;;  %v4529_v3 = vpack.c.bf16 %v3046_v1, %v3045_v0  ;;  %v3048_v4 = vld [vmem:[%s6457_s1 + $0x98] sm:$0xff]  ;;  %v3049_v6 = vld [vmem:[%s6457_s1 + $0xa0] sm:$0xff]  ;;  %s6411_s28 = scalar_lea.hbm %s6462_s6, %s3236_s19  ;;  %p6473_p9 = scmp.ne.s32.totalorder %s6466_s7, 0 }
  0x36   : > { %s261_s13 = scalar_select %p260_p5, %s5512_s25, 1  ;;  %v4533_v5 = vpack.c.bf16 %v3048_v4, %v3047_v2  ;;  %v3050_v7 = vld [vmem:[%s6457_s1 + $0xa8] sm:$0xff]  ;;  %v3051_v10 = vld [vmem:[%s6457_s1 + $0xb0] sm:$0xff]  ;;  %v3052_v11 = vld [vmem:[%s6457_s1 + $0xb8] sm:$0xff] }
  0x37   : > { %4530 = vmatprep.subr.bf16.mxu0 %v4529_v3  ;;  %v4537_v8 = vpack.c.bf16 %v3050_v7, %v3049_v6  ;;  %v4541_v12 = vpack.c.bf16 %v3052_v11, %v3051_v10  ;;  %v3053_v13 = vld [vmem:[%s6457_s1 + $0xc0] sm:$0xff]  ;;  %v3054_v14 = vld [vmem:[%s6457_s1 + $0xc8] sm:$0xff]  ;;  %v3055_v16 = vld [vmem:[%s6457_s1 + $0xd0] sm:$0xff]  ;;  %s5453_s10 = smov [#allocation6]  }
  0x38   : > { %s5297_s14 = smul.u32 576, %s261_s13  ;;  %4532 = vmatpush3.bf16.msra.mxu0 %v4529_v3  ;;  %v4545_v15 = vpack.c.bf16 %v3054_v14, %v3053_v13  ;;  %v3056_v17 = vld [vmem:[%s6457_s1 + $0xd8] sm:$0xff]  ;;  %v3057_v19 = vld [vmem:[%s6457_s1 + $0xe0] sm:$0xff]  ;;  %v3058_v20 = vld [vmem:[%s6457_s1 + $0xe8] sm:$0xff]  ;;  %s5385_s13 = sshll.u32 %s5453_s10, 4  ;;  %s5386_s13 = int_to_ptr.vmem [resolvable:$false] %s5385_s13 }
  0x39   : > { %4534 = vmatprep.subr.bf16.mxu0 %v4533_v5  ;;  %v4549_v18 = vpack.c.bf16 %v3056_v17, %v3055_v16  ;;  %v4553_v21 = vpack.c.bf16 %v3058_v20, %v3057_v19  ;;  %v3059_v22 = vld [vmem:[%s6457_s1 + $0xf0] sm:$0xff]  ;;  %v3060_v23 = vld [vmem:[%s6457_s1 + $0xf8] sm:$0xff]  ;;  %v273_v25 = vld [vmem:[%s6457_s1] sm:$0xff]  ;;  %s5387_s12 = scalar_lea.vmem %s5386_s13, 2048 }
  0x3a   : > { %s5597_s15 = scalar_lea.vmem %s6456_s0, %s5297_s14  ;;  %v4557_v24 = vpack.c.bf16 %v3060_v23, %v3059_v22  ;;  %v274_v26 = vld [vmem:[%s6457_s1 + $0x8] sm:$0xff]  ;;  %v275_v28 = vld [vmem:[%s6457_s1 + $0x10] sm:$0xff]  ;;  %v276_v29 = vld [vmem:[%s6457_s1 + $0x18] sm:$0xff]  ;;  %s257_s14 = sand.u32 1, %s5439_s22  }
  0x3b   : > { %v3037_v9 = vld [vmem:[%s5597_s15 + $0x90] sm:$0xff]  ;;  %v4561_v27 = vpack.c.bf16 %v274_v26, %v273_v25  ;;  %v5643_v30 = vld [vmem:[%s5597_s15 + $0xa0] sm:$0xff]  ;;  %v4565_v31 = vpack.c.bf16 %v276_v29, %v275_v28  ;;  %v278_v34 = vld [vmem:[%s6457_s1 + $0x28] sm:$0xff]  ;;  %s3035_s17 = sshll.u32 %s257_s14, 6  ;;  %s6415_s25 = scalar_lea.sflag [#allocation5], %s257_s14 }
  0x3c   : > { %3725 = vmatprep.mubr.f32.mxu0 %v3037_v9  ;;  %4536 = vmatpush3.bf16.msra.mxu0 %v4533_v5  ;;  %v5646_v32 = vld [vmem:[%s5597_s15 + $0xb0] sm:$0xff]  ;;  %v277_v33 = vld [vmem:[%s6457_s1 + $0x20] sm:$0xff]  ;;  %v280_v39 = vld [vmem:[%s6457_s1 + $0x38] sm:$0xff] }
  0x3d   : > { %4538 = vmatprep.subr.bf16.mxu0 %v4537_v8  ;;  %v5657_v35 = vld [vmem:[%s5597_s15 + $0xc0] sm:$0xff]  ;;  %v4569_v36 = vpack.c.bf16 %v278_v34, %v277_v33  ;;  %v5660_v37 = vld [vmem:[%s5597_s15 + $0xd0] sm:$0xff]  ;;  %v282_v44 = vld [vmem:[%s6457_s1 + $0x48] sm:$0xff] }
  0x3e   : > { %v279_v38 = vld [vmem:[%s6457_s1 + $0x30] sm:$0xff]  ;;  %v5671_v40 = vld [vmem:[%s5597_s15 + $0xe0] sm:$0xff]  ;;  %v284_v49 = vld [vmem:[%s6457_s1 + $0x58] sm:$0xff] }
  0x3f   : > { %v4573_v41 = vpack.c.bf16 %v280_v39, %v279_v38  ;;  %v5674_v42 = vld [vmem:[%s5597_s15 + $0xf0] sm:$0xff]  ;;  %v281_v43 = vld [vmem:[%s6457_s1 + $0x40] sm:$0xff]  ;;  %v286_v52 = vld [vmem:[%s6457_s1 + $0x68] sm:$0xff] }
  0x40   : > { %4540 = vmatpush3.bf16.msra.mxu0 %v4537_v8  ;;  %v5685_v45 = vld [vmem:[%s5597_s15 + $0x100] sm:$0xff]  ;;  %v4577_v46 = vpack.c.bf16 %v282_v44, %v281_v43  ;;  %v283_v48 = vld [vmem:[%s6457_s1 + $0x50] sm:$0xff]  ;;  %v288_v55 = vld [vmem:[%s6457_s1 + $0x78] sm:$0xff] }
  0x41   : > { %4542 = vmatprep.subr.bf16.mxu0 %v4541_v12  ;;  %v265_v47 = vld [vmem:[%s5597_s15] sm:$0xff]  ;;  %v4581_v50 = vpack.c.bf16 %v284_v49, %v283_v48  ;;  %v287_v54 = vld [vmem:[%s6457_s1 + $0x70] sm:$0xff]  ;;  %v3062_v58 = vld [vmem:[%s6457_s1 + $0x108] sm:$0xff] }
  0x42   : > { %v285_v51 = vld [vmem:[%s6457_s1 + $0x60] sm:$0xff]  ;;  %v4589_v56 = vpack.c.bf16 %v288_v55, %v287_v54  ;;  %v3063_v60 = vld [vmem:[%s6457_s1 + $0x110] sm:$0xff]  ;;  %v3064_v61 = vld [vmem:[%s6457_s1 + $0x118] sm:$0xff] }
  0x43   : > { %v4585_v53 = vpack.c.bf16 %v286_v52, %v285_v51  ;;  %v3061_v57 = vld [vmem:[%s6457_s1 + $0x100] sm:$0xff]  ;;  %v5720_v62 = vld [vmem:[%s5597_s15 + $0x10] sm:$0xff]  ;;  %v4597_v63 = vpack.c.bf16 %v3064_v61, %v3063_v60  ;;  %v3066_v2 = vld [vmem:[%s6457_s1 + $0x128] sm:$0xff] }
  0x44   : > { %4544 = vmatpush3.bf16.msra.mxu0 %v4541_v12  ;;  %v4593_v59 = vpack.c.bf16 %v3062_v58, %v3061_v57  ;;  %v5723_v0 = vld [vmem:[%s5597_s15 + $0x20] sm:$0xff]  ;;  %v5734_v3 = vld [vmem:[%s5597_s15 + $0x30] sm:$0xff]  ;;  %v3068_v7 = vld [vmem:[%s6457_s1 + $0x138] sm:$0xff] }
  0x45   : > { %4546 = vmatprep.subr.bf16.mxu0 %v4545_v15  ;;  %v3065_v1 = vld [vmem:[%s6457_s1 + $0x120] sm:$0xff]  ;;  %v3067_v6 = vld [vmem:[%s6457_s1 + $0x130] sm:$0xff]  ;;  %v3070_v12 = vld [vmem:[%s6457_s1 + $0x148] sm:$0xff] }
  0x46   : > { %v4601_v4 = vpack.c.bf16 %v3066_v2, %v3065_v1  ;;  %v5737_v5 = vld [vmem:[%s5597_s15 + $0x40] sm:$0xff]  ;;  %v5748_v8 = vld [vmem:[%s5597_s15 + $0x50] sm:$0xff]  ;;  %v4605_v9 = vpack.c.bf16 %v3068_v7, %v3067_v6  ;;  %v3072_v17 = vld [vmem:[%s6457_s1 + $0x158] sm:$0xff] }
  0x47   : > { %v5751_v10 = vld [vmem:[%s5597_s15 + $0x60] sm:$0xff]  ;;  %v5762_v13 = vld [vmem:[%s5597_s15 + $0x70] sm:$0xff]  ;;  %v3074_v20 = vld [vmem:[%s6457_s1 + $0x168] sm:$0xff] }
  0x48   : > { %4548 = vmatpush3.bf16.msra.mxu0 %v4545_v15  ;;  %v3069_v11 = vld [vmem:[%s6457_s1 + $0x140] sm:$0xff]  ;;  %v3071_v16 = vld [vmem:[%s6457_s1 + $0x150] sm:$0xff]  ;;  %v3076_v23 = vld [vmem:[%s6457_s1 + $0x178] sm:$0xff] }
  0x49   : > { %4550 = vmatprep.subr.bf16.mxu0 %v4549_v18  ;;  %v4609_v14 = vpack.c.bf16 %v3070_v12, %v3069_v11  ;;  %v525_v15 = vld [vmem:[%s5597_s15 + $0x1] sm:$0xff]  ;;  %v3075_v22 = vld [vmem:[%s6457_s1 + $0x170] sm:$0xff]  ;;  %v3088_v29 = vld [vmem:[%s6457_s1 + $0x198] sm:$0xff] }
  0x4a   : > { %v3073_v19 = vld [vmem:[%s6457_s1 + $0x160] sm:$0xff]  ;;  %v3086_v26 = vld [vmem:[%s6457_s1 + $0x188] sm:$0xff]  ;;  %v3087_v28 = vld [vmem:[%s6457_s1 + $0x190] sm:$0xff] }
  0x4b   : > { %v3085_v25 = vld [vmem:[%s6457_s1 + $0x180] sm:$0xff]  ;;  %v4629_v33 = vpack.c.bf16 %v3088_v29, %v3087_v28  ;;  %v3090_v38 = vld [vmem:[%s6457_s1 + $0x1a8] sm:$0xff]  ;;  %v5811_v39 = vld [vmem:[%s5597_s15 + $0x31] sm:$0xff] }
  0x4c   : > { %4552 = vmatpush3.bf16.msra.mxu0 %v4549_v18  ;;  %v4613_v18 = vpack.c.bf16 %v3072_v17, %v3071_v16  ;;  %v5800_v34 = vld [vmem:[%s5597_s15 + $0x21] sm:$0xff]  ;;  %v3091_v44 = vld [vmem:[%s6457_s1 + $0x1b0] sm:$0xff] }
  0x4d   : > { %4554 = vmatprep.subr.bf16.mxu0 %v4553_v21  ;;  %v5814_v43 = vld [vmem:[%s5597_s15 + $0x41] sm:$0xff]  ;;  %v5839_v52 = vld [vmem:[%s5597_s15 + $0x71] sm:$0xff] }
  0x4e   : > { %v5828_v49 = vld [vmem:[%s5597_s15 + $0x61] sm:$0xff]  ;;  %v3095_v55 = vld [vmem:[%s6457_s1 + $0x1d0] sm:$0xff] }
  0x4f   : > { %v3094_v51 = vld [vmem:[%s6457_s1 + $0x1c8] sm:$0xff]  ;;  %v3077_v54 = vld [vmem:[%s5597_s15 + $0x120] sm:$0xff]  ;;  %v3099_v61 = vld [vmem:[%s6457_s1 + $0x1f0] sm:$0xff] }
  0x50   : > { %4556 = vmatpush3.bf16.msra.mxu0 %v4553_v21  ;;  %v4617_v21 = vpack.c.bf16 %v3074_v20, %v3073_v19  ;;  %v3097_v58 = vld [vmem:[%s6457_s1 + $0x1e0] sm:$0xff]  ;;  %v3111_v7 = vld [vmem:[%s6457_s1 + $0x210] sm:$0xff]  ;;  %v3114_v16 = vld [vmem:[%s6457_s1 + $0x228] sm:$0xff] }
  0x51   : > { %4558 = vmatprep.subr.bf16.mxu0 %v4557_v24  ;;  %v3109_v2 = vld [vmem:[%s6457_s1 + $0x200] sm:$0xff]  ;;  %v3078_v11 = vld [vmem:[%s5597_s15 + $0x130] sm:$0xff] }
  0x52   : > { %v3080_v17 = vld [vmem:[%s5597_s15 + $0x150] sm:$0xff]  ;;  %v3081_v19 = vld [vmem:[%s5597_s15 + $0x160] sm:$0xff] }
  0x53   : > { %v3115_v20 = vld [vmem:[%s6457_s1 + $0x230] sm:$0xff] }
  0x54   : > { %4560 = vmatpush3.bf16.msra.mxu0 %v4557_v24  ;;  %v4621_v24 = vpack.c.bf16 %v3076_v23, %v3075_v22  ;;  %v3082_v22 = vld [vmem:[%s5597_s15 + $0x170] sm:$0xff] }
  0x55   : > { %4562 = vmatprep.subr.bf16.mxu0 %v4561_v27  ;;  %v3101_v29 = vld [vmem:[%s5597_s15 + $0x1b0] sm:$0xff] }
  0x57   : > { %3726 = vmatmul.mubr.f32.vlgmr.msra.gmra.mrb[0].mxu0 %v5643_v30 }
  0x58   : > { %4564 = vmatpush3.bf16.msra.mxu0 %v4561_v27  ;;  %3728 = vmatprep.mubr.f32.mxu0 %v5646_v32  ;;  %v4625_v27 = vpack.c.bf16 %v3086_v26, %v3085_v25  ;;  %v3117_v25 = vld [vmem:[%s6457_s1 + $0x240] sm:$0xff]  ;;  %v3118_v26 = vld [vmem:[%s6457_s1 + $0x248] sm:$0xff] }
  0x59   : > { %4566 = vmatprep.subr.bf16.mxu0 %v4565_v31  ;;  %v4673_v28 = vpack.c.bf16 %v3118_v26, %v3117_v25  ;;  %v1583_v25 = vld [vmem:[#allocation3 + $0x98] sm:$0xff] }
  0x5b   : > { %3729 = vmatmul.mubr.f32.gmra.mrb[2].mxu0 %v5657_v35 }
  0x5c   : > { %4568 = vmatpush3.bf16.msra.mxu0 %v4565_v31  ;;  %3731 = vmatprep.mubr.f32.mxu0 %v5660_v37  ;;  %v5797_v31 = vld [vmem:[%s5597_s15 + $0x11] sm:$0xff] }
  0x5d   : > { %4570 = vmatprep.subr.bf16.mxu0 %v4569_v36 }
  0x5f   : > { %3732 = vmatmul.mubr.f32.gmra.mrb[4].mxu0 %v5671_v40 }
  0x60   : > { %4572 = vmatpush3.bf16.msra.mxu0 %v4569_v36  ;;  %3734 = vmatprep.mubr.f32.mxu0 %v5674_v42  ;;  %v3089_v36 = vld [vmem:[%s6457_s1 + $0x1a0] sm:$0xff] }
  0x61   : > { %4574 = vmatprep.subr.bf16.mxu0 %v4573_v41 }
  0x63   : > { %3735 = vmatmul.mubr.f32.gmra.mrb[6].mxu0 %v5685_v45 }
  0x64   : > { %4576 = vmatpush3.bf16.msra.mxu0 %v4573_v41  ;;  %3769 = vmatprep.mubr.f32.mxu0 %v265_v47  ;;  %v4633_v41 = vpack.c.bf16 %v3090_v38, %v3089_v36  ;;  %v5825_v47 = vld [vmem:[%s5597_s15 + $0x51] sm:$0xff] }
  0x65   : > { %4578 = vmatprep.subr.bf16.mxu0 %v4577_v46  ;;  %v3120_v36 = vld [vmem:[%s6457_s1 + $0x258] sm:$0xff] }
  0x68   : > { %4580 = vmatpush3.bf16.msra.mxu0 %v4577_v46  ;;  %v3092_v46 = vld [vmem:[%s6457_s1 + $0x1b8] sm:$0xff] }
  0x69   : > { %4582 = vmatprep.subr.bf16.mxu0 %v4581_v50  ;;  %v4637_v48 = vpack.c.bf16 %v3092_v46, %v3091_v44  ;;  %v3122_v44 = vld [vmem:[%s6457_s1 + $0x268] sm:$0xff] }
  0x6c   : > { %4584 = vmatpush3.bf16.msra.mxu0 %v4581_v50  ;;  %v3093_v50 = vld [vmem:[%s6457_s1 + $0x1c0] sm:$0xff] }
  0x6d   : > { %4586 = vmatprep.subr.bf16.mxu0 %v4585_v53 }
  0x70   : > { %4588 = vmatpush3.bf16.msra.mxu0 %v4585_v53  ;;  %v4641_v53 = vpack.c.bf16 %v3094_v51, %v3093_v50  ;;  %v3124_v50 = vld [vmem:[%s6457_s1 + $0x278] sm:$0xff] }
  0x71   : > { %4590 = vmatprep.subr.bf16.mxu0 %v4589_v56 }
  0x74   : > { %4592 = vmatpush3.bf16.msra.mxu0 %v4589_v56  ;;  %v3096_v56 = vld [vmem:[%s6457_s1 + $0x1d8] sm:$0xff] }
  0x75   : > { %4594 = vmatprep.subr.bf16.mxu0 %v4593_v59  ;;  %v4645_v57 = vpack.c.bf16 %v3096_v56, %v3095_v55  ;;  %v3135_v56 = vld [vmem:[%s6457_s1 + $0x290] sm:$0xff] }
  0x77   : > { %3770 = vmatmul.mubr.f32.vlgmr.msra.gmra.mrb[0].mxu0 %v5720_v62 }
  0x78   : > { %4596 = vmatpush3.bf16.msra.mxu0 %v4593_v59  ;;  %3772 = vmatprep.mubr.f32.mxu0 %v5723_v0  ;;  %v3098_v59 = vld [vmem:[%s6457_s1 + $0x1e8] sm:$0xff] }
  0x79   : > { %4598 = vmatprep.subr.bf16.mxu0 %v4597_v63  ;;  %v4649_v60 = vpack.c.bf16 %v3098_v59, %v3097_v58  ;;  %v3102_v58 = vld [vmem:[%s5597_s15 + $0x1c0] sm:$0xff] }
  0x7b   : > { %3773 = vmatmul.mubr.f32.gmra.mrb[2].mxu0 %v5734_v3 }
  0x7c   : > { %4600 = vmatpush3.bf16.msra.mxu0 %v4597_v63  ;;  %3775 = vmatprep.mubr.f32.mxu0 %v5737_v5  ;;  %v3100_v63 = vld [vmem:[%s6457_s1 + $0x1f8] sm:$0xff] }
  0x7d   : > { %4602 = vmatprep.subr.bf16.mxu0 %v4601_v4  ;;  %v4653_v1 = vpack.c.bf16 %v3100_v63, %v3099_v61  ;;  %v3137_v61 = vld [vmem:[%s6457_s1 + $0x2a0] sm:$0xff]  ;;  %v3138_v63 = vld [vmem:[%s6457_s1 + $0x2a8] sm:$0xff] }
  0x7f   : > { %3776 = vmatmul.mubr.f32.gmra.mrb[4].mxu0 %v5748_v8 }
  0x80   : > { %4604 = vmatpush3.bf16.msra.mxu0 %v4601_v4  ;;  %3778 = vmatprep.mubr.f32.mxu0 %v5751_v10  ;;  %v3110_v4 = vld [vmem:[%s6457_s1 + $0x208] sm:$0xff] }
  0x81   : > { %4606 = vmatprep.subr.bf16.mxu0 %v4605_v9  ;;  %v4657_v6 = vpack.c.bf16 %v3110_v4, %v3109_v2  ;;  %v4697_v2 = vpack.c.bf16 %v3138_v63, %v3137_v61  ;;  %v3105_v4 = vld [vmem:[%s5597_s15 + $0x1f0] sm:$0xff]  ;;  %v3160_v61 = vld [vmem:[%s6457_s1 + $0x318] sm:$0xff] }
  0x82   : > { %v3126_v63 = vld [vmem:[%s5597_s15 + $0x131] sm:$0xff] }
  0x83   : > { %3779 = vmatmul.mubr.f32.gmra.mrb[6].mxu0 %v5762_v13 }
  0x84   : > { %4608 = vmatpush3.bf16.msra.mxu0 %v4605_v9  ;;  %3813 = vmatprep.mubr.f32.mxu0 %v525_v15  ;;  %v3112_v9 = vld [vmem:[%s6457_s1 + $0x218] sm:$0xff]  ;;  %v3113_v15 = vld [vmem:[%s6457_s1 + $0x220] sm:$0xff] }
  0x85   : > { %4610 = vmatprep.subr.bf16.mxu0 %v4609_v14  ;;  %v4661_v12 = vpack.c.bf16 %v3112_v9, %v3111_v7  ;;  %v3140_v7 = vld [vmem:[%s6457_s1 + $0x2b8] sm:$0xff]  ;;  %v3106_v9 = vld [vmem:[%s5597_s15 + $0x200] sm:$0xff] }
  0x88   : > { %4612 = vmatpush3.bf16.msra.mxu0 %v4609_v14  ;;  %v3079_v14 = vld [vmem:[%s5597_s15 + $0x140] sm:$0xff] }
  0x89   : > { %4614 = vmatprep.subr.bf16.mxu0 %v4613_v18 }
  0x8c   : > { %4616 = vmatpush3.bf16.msra.mxu0 %v4613_v18  ;;  %v4665_v18 = vpack.c.bf16 %v3114_v16, %v3113_v15  ;;  %v3142_v15 = vld [vmem:[%s6457_s1 + $0x2c8] sm:$0xff]  ;;  %v3108_v16 = vld [vmem:[%s5597_s15 + $0x220] sm:$0xff] }
  0x8d   : > { %4618 = vmatprep.subr.bf16.mxu0 %v4617_v21 }
  0x90   : > { %4620 = vmatpush3.bf16.msra.mxu0 %v4617_v21  ;;  %v3116_v21 = vld [vmem:[%s6457_s1 + $0x238] sm:$0xff] }
  0x91   : > { %4622 = vmatprep.subr.bf16.mxu0 %v4621_v24  ;;  %v4669_v23 = vpack.c.bf16 %v3116_v21, %v3115_v20  ;;  %v3144_v20 = vld [vmem:[%s6457_s1 + $0x2d8] sm:$0xff]  ;;  %v1580_v21 = vld [vmem:[#allocation3 + $0x80] sm:$0xff] }
  0x94   : > { %4624 = vmatpush3.bf16.msra.mxu0 %v4621_v24  ;;  %v3083_v24 = vld [vmem:[%s5597_s15 + $0x180] sm:$0xff] }
  0x95   : > { %4626 = vmatprep.subr.bf16.mxu0 %v4625_v27 }
  0x97   : > { %3814 = vmatmul.mubr.f32.vlgmr.msra.gmra.mrb[0].mxu0 %v5797_v31 }
  0x98   : > { %4628 = vmatpush3.bf16.msra.mxu0 %v4625_v27  ;;  %3816 = vmatprep.mubr.f32.mxu0 %v5800_v34  ;;  %v3084_v27 = vld [vmem:[%s5597_s15 + $0x190] sm:$0xff] }
  0x99   : > { %4630 = vmatprep.subr.bf16.mxu0 %v4629_v33 }
  0x9b   : > { %3817 = vmatmul.mubr.f32.gmra.mrb[2].mxu0 %v5811_v39 }
  0x9c   : > { %4632 = vmatpush3.bf16.msra.mxu0 %v4629_v33  ;;  %3819 = vmatprep.mubr.f32.mxu0 %v5814_v43  ;;  %v3119_v33 = vld [vmem:[%s6457_s1 + $0x250] sm:$0xff] }
  0x9d   : > { %4634 = vmatprep.subr.bf16.mxu0 %v4633_v41  ;;  %v4677_v38 = vpack.c.bf16 %v3120_v36, %v3119_v33  ;;  %v3145_v33 = vld [vmem:[%s6457_s1 + $0x2e0] sm:$0xff]  ;;  %v3146_v36 = vld [vmem:[%s6457_s1 + $0x2e8] sm:$0xff] }
  0x9f   : > { %3820 = vmatmul.mubr.f32.gmra.mrb[4].mxu0 %v5825_v47 }
  0xa0   : > { %4636 = vmatpush3.bf16.msra.mxu0 %v4633_v41  ;;  %3822 = vmatprep.mubr.f32.mxu0 %v5828_v49  ;;  %v3121_v41 = vld [vmem:[%s6457_s1 + $0x260] sm:$0xff] }
  0xa1   : > { %4638 = vmatprep.subr.bf16.mxu0 %v4637_v48  ;;  %v4681_v46 = vpack.c.bf16 %v3122_v44, %v3121_v41  ;;  %v4713_v41 = vpack.c.bf16 %v3146_v36, %v3145_v33  ;;  %v1586_v44 = vld [vmem:[#allocation3 + $0xb0] sm:$0xff]  ;;  %v3181_v33 = vld [vmem:[%s6457_s1 + $0x380] sm:$0xff]  ;;  %v3182_v36 = vld [vmem:[%s6457_s1 + $0x388] sm:$0xff] }
  0xa3   : > { %3823 = vmatmul.mubr.f32.gmra.mrb[6].mxu0 %v5839_v52 }
  0xa4   : > { %4640 = vmatpush3.bf16.msra.mxu0 %v4637_v48  ;;  %3857 = vmatprep.mubr.f32.mxu0 %v3077_v54  ;;  %v3123_v48 = vld [vmem:[%s6457_s1 + $0x270] sm:$0xff]  ;;  %v3134_v54 = vld [vmem:[%s6457_s1 + $0x288] sm:$0xff] }
  0xa5   : > { %4642 = vmatprep.subr.bf16.mxu0 %v4641_v53  ;;  %v4685_v51 = vpack.c.bf16 %v3124_v50, %v3123_v48  ;;  %v3147_v48 = vld [vmem:[%s6457_s1 + $0x2f0] sm:$0xff]  ;;  %v3148_v50 = vld [vmem:[%s6457_s1 + $0x2f8] sm:$0xff] }
  0xa8   : > { %4644 = vmatpush3.bf16.msra.mxu0 %v4641_v53  ;;  %v3133_v53 = vld [vmem:[%s6457_s1 + $0x280] sm:$0xff] }
  0xa9   : > { %4646 = vmatprep.subr.bf16.mxu0 %v4645_v57  ;;  %v4689_v55 = vpack.c.bf16 %v3134_v54, %v3133_v53  ;;  %v4717_v53 = vpack.c.bf16 %v3148_v50, %v3147_v48  ;;  %v1588_v54 = vld [vmem:[#allocation3 + $0xc0] sm:$0xff]  ;;  %v3186_v50 = vld [vmem:[%s6457_s1 + $0x3a8] sm:$0xff] }
  0xaa   : > { %v3185_v48 = vld [vmem:[%s6457_s1 + $0x3a0] sm:$0xff] }
  0xac   : > { %4648 = vmatpush3.bf16.msra.mxu0 %v4645_v57  ;;  %v3136_v57 = vld [vmem:[%s6457_s1 + $0x298] sm:$0xff] }
  0xad   : > { %4650 = vmatprep.subr.bf16.mxu0 %v4649_v60  ;;  %v4693_v59 = vpack.c.bf16 %v3136_v57, %v3135_v56  ;;  %v3157_v56 = vld [vmem:[%s6457_s1 + $0x300] sm:$0xff]  ;;  %v3158_v57 = vld [vmem:[%s6457_s1 + $0x308] sm:$0xff] }
  0xb0   : > { %4652 = vmatpush3.bf16.msra.mxu0 %v4649_v60  ;;  %v3103_v60 = vld [vmem:[%s5597_s15 + $0x1d0] sm:$0xff] }
  0xb1   : > { %4654 = vmatprep.subr.bf16.mxu0 %v4653_v1 }
  0xb4   : > { %4656 = vmatpush3.bf16.msra.mxu0 %v4653_v1  ;;  %v3104_v1 = vld [vmem:[%s5597_s15 + $0x1e0] sm:$0xff] }
  0xb5   : > { %4658 = vmatprep.subr.bf16.mxu0 %v4657_v6 }
  0xb7   : > { %3858 = vmatmul.mubr.f32.vlgmr.msra.gmra.mrb[0].mxu0 %v3078_v11 }
  0xb8   : > { %4660 = vmatpush3.bf16.msra.mxu0 %v4657_v6  ;;  %3860 = vmatprep.mubr.f32.mxu0 %v3079_v14  ;;  %v3139_v6 = vld [vmem:[%s6457_s1 + $0x2b0] sm:$0xff]  ;;  %v3141_v14 = vld [vmem:[%s6457_s1 + $0x2c0] sm:$0xff] }
  0xb9   : > { %4662 = vmatprep.subr.bf16.mxu0 %v4661_v12  ;;  %v4701_v11 = vpack.c.bf16 %v3140_v7, %v3139_v6  ;;  %v3162_v6 = vld [vmem:[%s6457_s1 + $0x328] sm:$0xff]  ;;  %v3128_v7 = vld [vmem:[%s5597_s15 + $0x151] sm:$0xff] }
  0xbb   : > { %3861 = vmatmul.mubr.f32.gmra.mrb[2].mxu0 %v3080_v17  ;;  %v4705_v17 = vpack.c.bf16 %v3142_v15, %v3141_v14  ;;  %v3164_v14 = vld [vmem:[%s6457_s1 + $0x338] sm:$0xff] }
  0xbc   : > { %4664 = vmatpush3.bf16.msra.mxu0 %v4661_v12  ;;  %3863 = vmatprep.mubr.f32.mxu0 %v3081_v19  ;;  %v3107_v12 = vld [vmem:[%s5597_s15 + $0x210] sm:$0xff] }
  0xbd   : > { %4666 = vmatprep.subr.bf16.mxu0 %v4665_v18  ;;  %v3143_v19 = vld [vmem:[%s6457_s1 + $0x2d0] sm:$0xff] }
  0xbe   : > { %v4709_v26 = vpack.c.bf16 %v3144_v20, %v3143_v19  ;;  %v3130_v15 = vld [vmem:[%s5597_s15 + $0x171] sm:$0xff]  ;;  %v3166_v19 = vld [vmem:[%s6457_s1 + $0x348] sm:$0xff] }
  0xbf   : > { %3864 = vmatmul.mubr.f32.gmra.mrb[4].mxu0 %v3082_v22  ;;  %v1581_v22 = vld [vmem:[#allocation3 + $0x88] sm:$0xff]  ;;  %v3132_v20 = vld [vmem:[%s5597_s15 + $0x191] sm:$0xff] }
  0xc0   : > { %4668 = vmatpush3.bf16.msra.mxu0 %v4665_v18  ;;  %3866 = vmatprep.mubr.f32.mxu0 %v3083_v24  ;;  %v3125_v18 = vld [vmem:[%s5597_s15 + $0x121] sm:$0xff]  ;;  %v4817_v24 = vpack.c.bf16 %v1581_v22, %v1580_v21  ;;  %v3167_v22 = vld [vmem:[%s6457_s1 + $0x350] sm:$0xff] }
  0xc1   : > { %4670 = vmatprep.subr.bf16.mxu0 %v4669_v23 }
  0xc2   : > { %4818 = vmatprep.subr.bf16.mxu1 %v4817_v24 }
  0xc3   : > { %3867 = vmatmul.mubr.f32.gmra.mrb[6].mxu0 %v3084_v27  ;;  %4820 = vmatpush3.bf16.msra.mxu1 %v4817_v24 }
  0xc4   : > { %4672 = vmatpush3.bf16.msra.mxu0 %v4669_v23  ;;  %3901 = vmatprep.mubr.f32.mxu0 %v3101_v29  ;;  %v1582_v23 = vld [vmem:[#allocation3 + $0x90] sm:$0xff]  ;;  %v1585_v29 = vld [vmem:[#allocation3 + $0xa8] sm:$0xff] }
  0xc5   : > { %4674 = vmatprep.subr.bf16.mxu0 %v4673_v28  ;;  %v4821_v27 = vpack.c.bf16 %v1583_v25, %v1582_v23  ;;  %v3168_v23 = vld [vmem:[%s6457_s1 + $0x358] sm:$0xff]  ;;  %v3169_v25 = vld [vmem:[%s6457_s1 + $0x360] sm:$0xff] }
  0xc6   : > { %v4741_v24 = vpack.c.bf16 %v3168_v23, %v3167_v22  ;;  %v3204_v23 = vld [vmem:[%s5597_s15 + $0x81] sm:$0xff] }
  0xc7   : > { %4822 = vmatprep.subr.bf16.mxu1 %v4821_v27 }
  0xc8   : > { %4676 = vmatpush3.bf16.msra.mxu0 %v4673_v28  ;;  %v1584_v28 = vld [vmem:[#allocation3 + $0xa0] sm:$0xff]  ;;  %4824 = vmatpush3.bf16.msra.mxu1 %v4821_v27 }
  0xc9   : > { %4678 = vmatprep.subr.bf16.mxu0 %v4677_v38 }
  0xcc   : > { %4680 = vmatpush3.bf16.msra.mxu0 %v4677_v38  ;;  %v4825_v38 = vpack.c.bf16 %v1585_v29, %v1584_v28  ;;  %v3171_v28 = vld [vmem:[%s6457_s1 + $0x370] sm:$0xff] }
  0xcd   : > { %4682 = vmatprep.subr.bf16.mxu0 %v4681_v46 }
  0xce   : > { %4826 = vmatprep.subr.bf16.mxu1 %v4825_v38 }
  0xcf   : > { %4828 = vmatpush3.bf16.msra.mxu1 %v4825_v38  ;;  %v4753_v38 = vpack.c.bf16 %v3182_v36, %v3181_v33  ;;  %v3221_v36 = vld [vmem:[%s6458_s2] ss:$0 sm:$0xff] }
  0xd0   : > { %4684 = vmatpush3.bf16.msra.mxu0 %v4681_v46  ;;  %v1587_v46 = vld [vmem:[#allocation3 + $0xb8] sm:$0xff] }
  0xd1   : > { %4686 = vmatprep.subr.bf16.mxu0 %v4685_v51 }
  0xd4   : > { %4688 = vmatpush3.bf16.msra.mxu0 %v4685_v51  ;;  %v4829_v51 = vpack.c.bf16 %v1587_v46, %v1586_v44  ;;  %v3184_v44 = vld [vmem:[%s6457_s1 + $0x398] sm:$0xff] }
  0xd5   : > { %4690 = vmatprep.subr.bf16.mxu0 %v4689_v55 }
  0xd6   : > { %4830 = vmatprep.subr.bf16.mxu1 %v4829_v51 }
  0xd7   : > { %3902 = vmatmul.mubr.f32.vlgmr.msra.gmra.mrb[0].mxu0 %v3102_v58  ;;  %4832 = vmatpush3.bf16.msra.mxu1 %v4829_v51  ;;  %v4761_v51 = vpack.c.bf16 %v3186_v50, %v3185_v48  ;;  %v1558_v48 = vld [vmem:[#allocation3 + $0x18] sm:$0xff] }
  0xd8   : > { %4692 = vmatpush3.bf16.msra.mxu0 %v4689_v55  ;;  %3904 = vmatprep.mubr.f32.mxu0 %v3103_v60  ;;  %v1589_v55 = vld [vmem:[#allocation3 + $0xc8] sm:$0xff]  ;;  %v3159_v60 = vld [vmem:[%s6457_s1 + $0x310] sm:$0xff] }
  0xd9   : > { %4694 = vmatprep.subr.bf16.mxu0 %v4693_v59  ;;  %v4833_v58 = vpack.c.bf16 %v1589_v55, %v1588_v54  ;;  %v3188_v54 = vld [vmem:[%s6457_s1 + $0x3b8] sm:$0xff]  ;;  %v3190_v55 = vld [vmem:[%s6457_s1 + $0x3c8] sm:$0xff] }
  0xdb   : > { %3905 = vmatmul.mubr.f32.gmra.mrb[2].mxu0 %v3104_v1  ;;  %4834 = vmatprep.subr.bf16.mxu1 %v4833_v58  ;;  %v4725_v1 = vpack.c.bf16 %v3160_v61, %v3159_v60  ;;  %v3195_v60 = vld [vmem:[%s6457_s1 + $0x3f0] sm:$0xff] }
  0xdc   : > { %4696 = vmatpush3.bf16.msra.mxu0 %v4693_v59  ;;  %3907 = vmatprep.mubr.f32.mxu0 %v3105_v4  ;;  %v4721_v59 = vpack.c.bf16 %v3158_v57, %v3157_v56  ;;  %v3161_v4 = vld [vmem:[%s6457_s1 + $0x320] sm:$0xff]  ;;  %v3192_v57 = vld [vmem:[%s6457_s1 + $0x3d8] sm:$0xff] }
  0xdd   : > { %4698 = vmatprep.subr.bf16.mxu0 %v4697_v2  ;;  %4836 = vmatpush3.bf16.msra.mxu1 %v4833_v58  ;;  %v3156_v56 = vld [vmem:[%s5597_s15 + $0x80] sm:$0xff]  ;;  %v3194_v58 = vld [vmem:[%s6457_s1 + $0x3e8] sm:$0xff] }
  0xdf   : > { %3908 = vmatmul.mubr.f32.gmra.mrb[4].mxu0 %v3106_v9  ;;  %v4729_v9 = vpack.c.bf16 %v3162_v6, %v3161_v4  ;;  %v3207_v4 = vld [vmem:[%s6457_s1 + $0x410] sm:$0xff]  ;;  %v3208_v6 = vld [vmem:[%s6457_s1 + $0x418] sm:$0xff] }
  0xe0   : > { %4700 = vmatpush3.bf16.msra.mxu0 %v4697_v2  ;;  %3910 = vmatprep.mubr.f32.mxu0 %v3107_v12  ;;  %v3127_v2 = vld [vmem:[%s5597_s15 + $0x141] sm:$0xff]  ;;  %v3163_v12 = vld [vmem:[%s6457_s1 + $0x330] sm:$0xff] }
  0xe1   : > { %4702 = vmatprep.subr.bf16.mxu0 %v4701_v11 }
  0xe3   : > { %3911 = vmatmul.mubr.f32.gmra.mrb[6].mxu0 %v3108_v16  ;;  %v4733_v16 = vpack.c.bf16 %v3164_v14, %v3163_v12  ;;  %v3211_v14 = vld [vmem:[%s6457_s1 + $0x430] sm:$0xff] }
  0xe4   : > { %4704 = vmatpush3.bf16.msra.mxu0 %v4701_v11  ;;  %3945 = vmatprep.mubr.f32.mxu0 %v3125_v18  ;;  %v3129_v11 = vld [vmem:[%s5597_s15 + $0x161] sm:$0xff] }
  0xe5   : > { %4706 = vmatprep.subr.bf16.mxu0 %v4705_v17  ;;  %v3165_v18 = vld [vmem:[%s6457_s1 + $0x340] sm:$0xff] }
  0xe6   : > { %v4737_v21 = vpack.c.bf16 %v3166_v19, %v3165_v18  ;;  %v3216_v18 = vld [vmem:[%s6457_s1 + $0x458] sm:$0xff]  ;;  %v3218_v19 = vld [vmem:[%s6457_s1 + $0x468] sm:$0xff] }
  0xe8   : > { %4708 = vmatpush3.bf16.msra.mxu0 %v4705_v17  ;;  %v3131_v17 = vld [vmem:[%s5597_s15 + $0x181] sm:$0xff] }
  0xe9   : > { %4710 = vmatprep.subr.bf16.mxu0 %v4709_v26 }
  0xec   : > { %4712 = vmatpush3.bf16.msra.mxu0 %v4709_v26  ;;  %v3170_v26 = vld [vmem:[%s6457_s1 + $0x368] sm:$0xff] }
  0xed   : > { %4714 = vmatprep.subr.bf16.mxu0 %v4713_v41  ;;  %v4745_v27 = vpack.c.bf16 %v3170_v26, %v3169_v25  ;;  %v1591_v25 = vld [vmem:[#allocation3 + $0xd8] sm:$0xff] }
  0xf0   : > { %4716 = vmatpush3.bf16.msra.mxu0 %v4713_v41  ;;  %v3183_v41 = vld [vmem:[%s6457_s1 + $0x390] sm:$0xff] }
  0xf1   : > { %4718 = vmatprep.subr.bf16.mxu0 %v4717_v53  ;;  %v4757_v46 = vpack.c.bf16 %v3184_v44, %v3183_v41 }
  0xf4   : > { %4720 = vmatpush3.bf16.msra.mxu0 %v4717_v53  ;;  %v3187_v53 = vld [vmem:[%s6457_s1 + $0x3b0] sm:$0xff] }
  0xf5   : > { %4722 = vmatprep.subr.bf16.mxu0 %v4721_v59 }
  0xf7   : > { %3946 = vmatmul.mubr.f32.vlgmr.msra.gmra.mrb[0].mxu0 %v3126_v63  ;;  %v3205_v63 = vld [vmem:[%s6457_s1 + $0x400] sm:$0xff] }
  0xf8   : > { %4724 = vmatpush3.bf16.msra.mxu0 %v4721_v59  ;;  %3948 = vmatprep.mubr.f32.mxu0 %v3127_v2 }
  0xf9   : > { %4726 = vmatprep.subr.bf16.mxu0 %v4725_v1 }
  0xfb   : > { %3949 = vmatmul.mubr.f32.gmra.mrb[2].mxu0 %v3128_v7  ;;  %v4789_v7 = vpack.c.bf16 %v3208_v6, %v3207_v4 }
  0xfc   : > { %4728 = vmatpush3.bf16.msra.mxu0 %v4725_v1  ;;  %3951 = vmatprep.mubr.f32.mxu0 %v3129_v11  ;;  %v3206_v1 = vld [vmem:[%s6457_s1 + $0x408] sm:$0xff] }
  0xfd   : > { %4730 = vmatprep.subr.bf16.mxu0 %v4729_v9  ;;  %v4785_v2 = vpack.c.bf16 %v3206_v1, %v3205_v63  ;;  %v3210_v11 = vld [vmem:[%s6457_s1 + $0x428] sm:$0xff] }
  0xff   : > { %3952 = vmatmul.mubr.f32.gmra.mrb[4].mxu0 %v3130_v15  ;;  %v3212_v15 = vld [vmem:[%s6457_s1 + $0x438] sm:$0xff] }
 0x100   : > { %4732 = vmatpush3.bf16.msra.mxu0 %v4729_v9  ;;  %3954 = vmatprep.mubr.f32.mxu0 %v3131_v17  ;;  %v3209_v9 = vld [vmem:[%s6457_s1 + $0x420] sm:$0xff]  ;;  %v3180_v17 = vld [vmem:[%s5597_s15 + $0x110] sm:$0xff] }
 0x101   : > { %4734 = vmatprep.subr.bf16.mxu0 %v4733_v16  ;;  %v4793_v12 = vpack.c.bf16 %v3210_v11, %v3209_v9  ;;  %v1563_v11 = vld [vmem:[#allocation3 + $0x40] sm:$0xff] }
 0x103   : > { %3955 = vmatmul.mubr.f32.gmra.mrb[6].mxu0 %v3132_v20 }
 0x104   : > { %4736 = vmatpush3.bf16.msra.mxu0 %v4733_v16  ;;  %3989 = vmatprep.mubr.f32.mxu0 %v5720_v62  ;;  %v3172_v62 = vld [vmem:[%s6457_s1 + $0x378] sm:$0xff]  ;;  %v3214_v16 = vld [vmem:[%s6457_s1 + $0x448] sm:$0xff] }
 0x105   : > { %4738 = vmatprep.subr.bf16.mxu0 %v4737_v21  ;;  %v4749_v29 = vpack.c.bf16 %v3172_v62, %v3171_v28  ;;  %v1593_v28 = vld [vmem:[#allocation3 + $0xe8] sm:$0xff]  ;;  %v5452_v62 = vmov 0.0  }
 0x106   : > { %1522 = vst [vmem:[#allocation2 + $0x20] sm:$0xff] %v5452_v62  ;;  %1523 = vst [vmem:[#allocation2 + $0x28] sm:$0x3] %v5452_v62 }
 0x107   : > { %1518 = vst [vmem:[#allocation2] sm:$0xff] %v5452_v62  ;;  %1519 = vst [vmem:[#allocation2 + $0x8] sm:$0x3] %v5452_v62 }
 0x108   : > { %4740 = vmatpush3.bf16.msra.mxu0 %v4737_v21  ;;  %v3219_v21 = vld [vmem:[%s6457_s1 + $0x470] sm:$0xff]  ;;  %1520 = vst [vmem:[#allocation2 + $0x10] sm:$0xff] %v5452_v62  ;;  %1521 = vst [vmem:[#allocation2 + $0x18] sm:$0x3] %v5452_v62 }
 0x109   : > { %4742 = vmatprep.subr.bf16.mxu0 %v4741_v24  ;;  %1524 = vst [vmem:[#allocation2 + $0x30] sm:$0xff] %v5452_v62  ;;  %1525 = vst [vmem:[#allocation2 + $0x38] sm:$0x3] %v5452_v62 }
 0x10a   : > { %1526 = vst [vmem:[#allocation2 + $0x40] sm:$0xff] %v5452_v62  ;;  %1527 = vst [vmem:[#allocation2 + $0x48] sm:$0x3] %v5452_v62 }
 0x10b   : > { %1528 = vst [vmem:[#allocation2 + $0x50] sm:$0xff] %v5452_v62  ;;  %1529 = vst [vmem:[#allocation2 + $0x58] sm:$0x3] %v5452_v62 }
 0x10c   : > { %4744 = vmatpush3.bf16.msra.mxu0 %v4741_v24  ;;  %v1590_v24 = vld [vmem:[#allocation3 + $0xd0] sm:$0xff]  ;;  %1530 = vst [vmem:[#allocation2 + $0x60] sm:$0xff] %v5452_v62  ;;  %1531 = vst [vmem:[#allocation2 + $0x68] sm:$0x3] %v5452_v62 }
 0x10d   : > { %4746 = vmatprep.subr.bf16.mxu0 %v4745_v27  ;;  %v4837_v26 = vpack.c.bf16 %v1591_v25, %v1590_v24  ;;  %1532 = vst [vmem:[#allocation2 + $0x70] sm:$0xff] %v5452_v62  ;;  %1533 = vst [vmem:[#allocation2 + $0x78] sm:$0x3] %v5452_v62  ;;  %v1818_v24 = vld [vmem:[#allocation3 + $0x118] sm:$0xff] }
 0x10e   : > { %1534 = vst [vmem:[#allocation2 + $0x80] sm:$0xff] %v5452_v62  ;;  %1535 = vst [vmem:[#allocation2 + $0x88] sm:$0x3] %v5452_v62  ;;  %v1571_v33 = vld [vmem:[#allocation2 + $0x1] sm:$0xff] }
 0x10f   : > { %4838 = vmatprep.subr.bf16.mxu1 %v4837_v26  ;;  %1536 = vst [vmem:[#allocation2 + $0x90] sm:$0xff] %v5452_v62  ;;  %1537 = vst [vmem:[#allocation2 + $0x98] sm:$0x3] %v5452_v62  ;;  %4121 = vmatprep.mubr.f32.mxu1 %v1571_v33 }
 0x110   : > { %4748 = vmatpush3.bf16.msra.mxu0 %v4745_v27  ;;  %4840 = vmatpush3.bf16.msra.mxu1 %v4837_v26  ;;  %v1592_v27 = vld [vmem:[#allocation3 + $0xe0] sm:$0xff] }
 0x111   : > { %4750 = vmatprep.subr.bf16.mxu0 %v4749_v29 }
 0x114   : > { %4752 = vmatpush3.bf16.msra.mxu0 %v4749_v29 }
 0x115   : > { %4754 = vmatprep.subr.bf16.mxu0 %v4753_v38 }
 0x117   : > { %3990 = vmatmul.mubr.f32.vlgmr.msra.gmra.mrb[0].mxu0 %v5723_v0  ;;  %v4765_v0 = vpack.c.bf16 %v3188_v54, %v3187_v53 }
 0x118   : > { %4756 = vmatpush3.bf16.msra.mxu0 %v4753_v38  ;;  %3992 = vmatprep.mubr.f32.mxu0 %v5734_v3  ;;  %v3189_v3 = vld [vmem:[%s6457_s1 + $0x3c0] sm:$0xff] }
 0x119   : > { %4758 = vmatprep.subr.bf16.mxu0 %v4757_v46 }
 0x11b   : > { %3993 = vmatmul.mubr.f32.gmra.mrb[2].mxu0 %v5737_v5  ;;  %v4769_v5 = vpack.c.bf16 %v3190_v55, %v3189_v3 }
 0x11c   : > { %4760 = vmatpush3.bf16.msra.mxu0 %v4757_v46  ;;  %3995 = vmatprep.mubr.f32.mxu0 %v5748_v8  ;;  %v3191_v8 = vld [vmem:[%s6457_s1 + $0x3d0] sm:$0xff] }
 0x11d   : > { %4762 = vmatprep.subr.bf16.mxu0 %v4761_v51  ;;  %v1557_v46 = vld [vmem:[#allocation3 + $0x10] sm:$0xff] }
 0x11f   : > { %3996 = vmatmul.mubr.f32.gmra.mrb[4].mxu0 %v5751_v10  ;;  %v4773_v10 = vpack.c.bf16 %v3192_v57, %v3191_v8 }
 0x120   : > { %4764 = vmatpush3.bf16.msra.mxu0 %v4761_v51  ;;  %3998 = vmatprep.mubr.f32.mxu0 %v5762_v13  ;;  %v3193_v13 = vld [vmem:[%s6457_s1 + $0x3e0] sm:$0xff] }
 0x121   : > { %4766 = vmatprep.subr.bf16.mxu0 %v4765_v0  ;;  %v4777_v59 = vpack.c.bf16 %v3194_v58, %v3193_v13 }
 0x123   : > { %3999 = vmatmul.mubr.f32.gmra.mrb[6].mxu0 %v3156_v56  ;;  %v1559_v56 = vld [vmem:[#allocation3 + $0x20] sm:$0xff] }
 0x124   : > { %4768 = vmatpush3.bf16.msra.mxu0 %v4765_v0  ;;  %4033 = vmatprep.mubr.f32.mxu0 %v5643_v30  ;;  %v3196_v30 = vld [vmem:[%s6457_s1 + $0x3f8] sm:$0xff]  ;;  %v4853_v0 = vpack.c.bf16 %v1558_v48, %v1557_v46  ;;  %v1806_v46 = vld [vmem:[#allocation2 + $0x2] sm:$0xff] }
 0x125   : > { %4770 = vmatprep.subr.bf16.mxu0 %v4769_v5  ;;  %v4781_v61 = vpack.c.bf16 %v3196_v30, %v3195_v60  ;;  %v1561_v30 = vld [vmem:[#allocation3 + $0x30] sm:$0xff] }
 0x128   : > { %4772 = vmatpush3.bf16.msra.mxu0 %v4769_v5  ;;  %v1560_v5 = vld [vmem:[#allocation3 + $0x28] sm:$0xff] }
 0x129   : > { %4774 = vmatprep.subr.bf16.mxu0 %v4773_v10  ;;  %v4857_v58 = vpack.c.bf16 %v1560_v5, %v1559_v56  ;;  %v1829_v5 = vld [vmem:[#allocation3 + $0x170] sm:$0xff] }
 0x12c   : > { %4776 = vmatpush3.bf16.msra.mxu0 %v4773_v10 }
 0x12d   : > { %4778 = vmatprep.subr.bf16.mxu0 %v4777_v59 }
 0x130   : > { %4780 = vmatpush3.bf16.msra.mxu0 %v4777_v59 }
 0x131   : > { %4782 = vmatprep.subr.bf16.mxu0 %v4781_v61 }
 0x134   : > { %4784 = vmatpush3.bf16.msra.mxu0 %v4781_v61  ;;  %v1562_v61 = vld [vmem:[#allocation3 + $0x38] sm:$0xff] }
 0x135   : > { %4786 = vmatprep.subr.bf16.mxu0 %v4785_v2  ;;  %v4861_v6 = vpack.c.bf16 %v1562_v61, %v1561_v30  ;;  %v1955_v30 = vld [vmem:[#allocation3 + $0x190] sm:$0xff]  ;;  %v1956_v61 = vld [vmem:[#allocation3 + $0x198] sm:$0xff] }
 0x137   : > { %4034 = vmatmul.mubr.f32.vlgmr.msra.gmra.mrb[0].mxu0 %v5646_v32  ;;  %v4797_v32 = vpack.c.bf16 %v3212_v15, %v3211_v14 }
 0x138   : > { %4788 = vmatpush3.bf16.msra.mxu0 %v4785_v2  ;;  %4036 = vmatprep.mubr.f32.mxu0 %v5657_v35  ;;  %v3213_v35 = vld [vmem:[%s6457_s1 + $0x440] sm:$0xff] }
 0x139   : > { %4790 = vmatprep.subr.bf16.mxu0 %v4789_v7 }
 0x13b   : > { %4037 = vmatmul.mubr.f32.gmra.mrb[2].mxu0 %v5660_v37  ;;  %v4801_v37 = vpack.c.bf16 %v3214_v16, %v3213_v35  ;;  %v1565_v16 = vld [vmem:[#allocation3 + $0x50] sm:$0xff] }
 0x13c   : > { %4792 = vmatpush3.bf16.msra.mxu0 %v4789_v7  ;;  %4039 = vmatprep.mubr.f32.mxu0 %v5671_v40  ;;  %v3215_v40 = vld [vmem:[%s6457_s1 + $0x450] sm:$0xff] }
 0x13d   : > { %4794 = vmatprep.subr.bf16.mxu0 %v4793_v12 }
 0x13f   : > { %4040 = vmatmul.mubr.f32.gmra.mrb[4].mxu0 %v5674_v42  ;;  %v4805_v42 = vpack.c.bf16 %v3216_v18, %v3215_v40  ;;  %v1567_v40 = vld [vmem:[#allocation3 + $0x60] sm:$0xff]  ;;  %v1568_v18 = vld [vmem:[#allocation3 + $0x68] sm:$0xff] }
 0x140   : > { %4796 = vmatpush3.bf16.msra.mxu0 %v4793_v12  ;;  %4042 = vmatprep.mubr.f32.mxu0 %v5685_v45  ;;  %v3217_v45 = vld [vmem:[%s6457_s1 + $0x460] sm:$0xff]  ;;  %v1564_v12 = vld [vmem:[#allocation3 + $0x48] sm:$0xff] }
 0x141   : > { %4798 = vmatprep.subr.bf16.mxu0 %v4797_v32  ;;  %v4809_v20 = vpack.c.bf16 %v3218_v19, %v3217_v45  ;;  %v4865_v35 = vpack.c.bf16 %v1564_v12, %v1563_v11  ;;  %v1569_v45 = vld [vmem:[#allocation3 + $0x70] sm:$0xff]  ;;  %v1570_v19 = vld [vmem:[#allocation3 + $0x78] sm:$0xff] }
 0x143   : > { %4043 = vmatmul.mubr.f32.gmra.mrb[6].mxu0 %v3180_v17  ;;  %v1566_v17 = vld [vmem:[#allocation3 + $0x58] sm:$0xff] }
 0x144   : > { %4800 = vmatpush3.bf16.msra.mxu0 %v4797_v32  ;;  %4077 = vmatprep.mubr.f32.mxu0 %v5797_v31  ;;  %v3220_v31 = vld [vmem:[%s6457_s1 + $0x478] sm:$0xff] }
 0x145   : > { %4802 = vmatprep.subr.bf16.mxu0 %v4801_v37  ;;  %v4813_v22 = vpack.c.bf16 %v3220_v31, %v3219_v21  ;;  %v1815_v21 = vld [vmem:[#allocation3 + $0x100] sm:$0xff]  ;;  %v1816_v31 = vld [vmem:[#allocation3 + $0x108] sm:$0xff] }
 0x148   : > { %4804 = vmatpush3.bf16.msra.mxu0 %v4801_v37  ;;  %v4869_v37 = vpack.c.bf16 %v1566_v17, %v1565_v16 }
 0x149   : > { %4806 = vmatprep.subr.bf16.mxu0 %v4805_v42 }
 0x14c   : > { %4808 = vmatpush3.bf16.msra.mxu0 %v4805_v42  ;;  %v4873_v42 = vpack.c.bf16 %v1568_v18, %v1567_v40  ;;  %v1961_v40 = vld [vmem:[#allocation3 + $0x1c0] sm:$0xff]  ;;  %v1962_v18 = vld [vmem:[#allocation3 + $0x1c8] sm:$0xff] }
 0x14d   : > { %4810 = vmatprep.subr.bf16.mxu0 %v4809_v20 }
 0x150   : > { %4812 = vmatpush3.bf16.msra.mxu0 %v4809_v20  ;;  %v4877_v20 = vpack.c.bf16 %v1570_v19, %v1569_v45  ;;  %v4929_v45 = vpack.c.bf16 %v1962_v18, %v1961_v40  ;;  %v2103_v18 = vld [vmem:[#allocation3 + $0x260] sm:$0xff] }
 0x151   : > { %4814 = vmatprep.subr.bf16.mxu0 %v4813_v22 }
 0x154   : > { %4816 = vmatpush3.bf16.msra.mxu0 %v4813_v22  ;;  %v4881_v22 = vpack.c.bf16 %v1816_v31, %v1815_v21  ;;  %v1964_v21 = vld [vmem:[#allocation3 + $0x1d8] sm:$0xff] }
 0x157   : > { %4078 = vmatmul.mubr.f32.vlgmr.msra.gmra.mrb[0].mxu0 %v5800_v34  ;;  %v4841_v34 = vpack.c.bf16 %v1593_v28, %v1592_v27  ;;  %v1819_v27 = vld [vmem:[#allocation3 + $0x120] sm:$0xff]  ;;  %v1820_v28 = vld [vmem:[#allocation3 + $0x128] sm:$0xff] }
 0x158   : > { %4080 = vmatprep.mubr.f32.mxu0 %v5811_v39  ;;  %v1594_v39 = vld [vmem:[#allocation3 + $0xf0] sm:$0xff] }
 0x159   : > { %4842 = vmatprep.subr.bf16.mxu1 %v4841_v34 }
 0x15a   : > { %4844 = vmatpush3.bf16.msra.mxu1 %v4841_v34 }
 0x15b   : > { %4081 = vmatmul.mubr.f32.gmra.mrb[2].mxu0 %v5814_v43  ;;  %v1595_v43 = vld [vmem:[#allocation3 + $0xf8] sm:$0xff] }
 0x15c   : > { %4083 = vmatprep.mubr.f32.mxu0 %v5825_v47  ;;  %v4845_v47 = vpack.c.bf16 %v1595_v43, %v1594_v39  ;;  %v4889_v39 = vpack.c.bf16 %v1820_v28, %v1819_v27  ;;  %v1968_v27 = vld [vmem:[#allocation3 + $0x1f8] sm:$0xff] }
 0x15e   : > { %4846 = vmatprep.subr.bf16.mxu1 %v4845_v47 }
 0x15f   : > { %4084 = vmatmul.mubr.f32.gmra.mrb[4].mxu0 %v5828_v49  ;;  %4848 = vmatpush3.bf16.msra.mxu1 %v4845_v47  ;;  %v1555_v49 = vld [vmem:[#allocation3] sm:$0xff]  ;;  %v1821_v47 = vld [vmem:[#allocation3 + $0x130] sm:$0xff] }
 0x160   : > { %4086 = vmatprep.mubr.f32.mxu0 %v5839_v52  ;;  %v1556_v52 = vld [vmem:[#allocation3 + $0x8] sm:$0xff] }
 0x161   : > { %v4849_v29 = vpack.c.bf16 %v1556_v52, %v1555_v49  ;;  %v1822_v49 = vld [vmem:[#allocation3 + $0x138] sm:$0xff] }
 0x163   : > { %4087 = vmatmul.mubr.f32.gmra.mrb[6].mxu0 %v3204_v23  ;;  %4850 = vmatprep.subr.bf16.mxu1 %v4849_v29  ;;  %v1817_v23 = vld [vmem:[#allocation3 + $0x110] sm:$0xff] }
 0x164   : > { %v4885_v25 = vpack.c.bf16 %v1818_v24, %v1817_v23  ;;  %v1966_v23 = vld [vmem:[#allocation3 + $0x1e8] sm:$0xff] }
 0x22a   : > { %v4079_v38 = vpop.f32.mrb[0].mxu0 }
 0x22b   : > { %v1503_v41 = vadd.f32 %v4079_v38, %v3221_v36  ;;  %v1448_v44 = vpop.f32.mrb[1].mxu0  ;;  %v1824_v38 = vld [vmem:[#allocation3 + $0x148] sm:$0xff] }
 0x22c   : > { %v1502_v50 = vadd.f32 %v3221_v36, %v1448_v44 }
 0x22d   : > { %v6171_v51 = vmax.f32 %v1503_v41, 0.0 }
 0x22e   : > { %v6173_v53 = vmax.f32 %v1502_v50, 0.0  ;;  %v4082_v54 = vpop.f32.mrb[2].mxu0  ;;  %v1825_v50 = vld [vmem:[#allocation3 + $0x150] sm:$0xff] }
 0x22f   : > { %1540 = vst [vmem:[#allocation2 + $0x21] sm:$0xff] %v6171_v51  ;;  %v1505_v3 = vadd.f32 %v4082_v54, %v3221_v36  ;;  %v1458_v55 = vpop.f32.mrb[3].mxu0  ;;  %v1826_v54 = vld [vmem:[#allocation3 + $0x158] sm:$0xff] }
 0x230   : > { %1539 = vst [vmem:[#allocation2 + $0x11] sm:$0xff] %v6173_v53  ;;  %v1504_v8 = vadd.f32 %v3221_v36, %v1458_v55  ;;  %4122 = vmatmul.mubr.f32.vlgmr.msra.gmra.mrb[0].mxu1 %v6173_v53  ;;  %v1828_v55 = vld [vmem:[#allocation3 + $0x168] sm:$0xff] }
 0x231   : > { %v6178_v57 = vmax.f32 %v1505_v3, 0.0  ;;  %4852 = vmatpush3.bf16.msra.mxu1 %v4849_v29  ;;  %4124 = vmatprep.mubr.f32.mxu1 %v6171_v51  ;;  %v4893_v29 = vpack.c.bf16 %v1822_v49, %v1821_v47  ;;  %v1827_v3 = vld [vmem:[#allocation3 + $0x160] sm:$0xff]  ;;  %v2092_v47 = vld [vmem:[#allocation3 + $0x208] sm:$0xff] }
 0x232   : > { %v6181_v10 = vmax.f32 %v1504_v8, 0.0  ;;  %v4085_v13 = vpop.f32.mrb[4].mxu0  ;;  %4854 = vmatprep.subr.bf16.mxu1 %v4853_v0  ;;  %v4905_v56 = vpack.c.bf16 %v1828_v55, %v1827_v3  ;;  %v1830_v8 = vld [vmem:[#allocation3 + $0x178] sm:$0xff]  ;;  %v2097_v3 = vld [vmem:[#allocation3 + $0x230] sm:$0xff] }
 0x233   : > { %1542 = vst [vmem:[#allocation2 + $0x41] sm:$0xff] %v6178_v57  ;;  %v1507_v59 = vadd.f32 %v4085_v13, %v3221_v36  ;;  %v1468_v60 = vpop.f32.mrb[5].mxu0  ;;  %v4909_v13 = vpack.c.bf16 %v1830_v8, %v1829_v5  ;;  %v2098_v55 = vld [vmem:[#allocation3 + $0x238] sm:$0xff] }
 0x234   : > { %1541 = vst [vmem:[#allocation2 + $0x31] sm:$0xff] %v6181_v10  ;;  %v1506_v63 = vadd.f32 %v3221_v36, %v1468_v60  ;;  %4125 = vmatmul.mubr.f32.gmra.mrb[2].mxu1 %v6181_v10  ;;  %v2799_v5 = vld [vmem:[%s6461_s5 + $0x18] sm:$0xff] }
 0x235   : > { %v6186_v1 = vmax.f32 %v1507_v59, 0.0  ;;  %4856 = vmatpush3.bf16.msra.mxu1 %v4853_v0  ;;  %4127 = vmatprep.mubr.f32.mxu1 %v6178_v57  ;;  %v4901_v0 = vpack.c.bf16 %v1826_v54, %v1825_v50  ;;  %v1954_v59 = vld [vmem:[#allocation3 + $0x188] sm:$0xff] }
 0x236   : > { %v6189_v2 = vmax.f32 %v1506_v63, 0.0  ;;  %v4088_v4 = vpop.f32.mrb[6].mxu0  ;;  %4858 = vmatprep.subr.bf16.mxu1 %v4857_v58  ;;  %v6206_v34 = vld [vmem:[#allocation2 + $0x20] sm:$0xff]  ;;  %v4917_v63 = vpack.c.bf16 %v1956_v61, %v1955_v30  ;;  %v2797_v50 = vld [vmem:[%s6461_s5 + $0x8] sm:$0xff] }
 0x237   : > { %1544 = vst [vmem:[#allocation2 + $0x61] sm:$0xff] %v6186_v1  ;;  %v1509_v7 = vadd.f32 %v4088_v4, %v3221_v36  ;;  %v1478_v9 = vpop.f32.mrb[7].mxu0  ;;  %v6203_v26 = vld [vmem:[#allocation2 + $0x10] sm:$0xff]  ;;  %v2801_v30 = vld [vmem:[%s6461_s5 + $0x28] sm:$0xff] }
 0x238   : > { %1543 = vst [vmem:[#allocation2 + $0x51] sm:$0xff] %v6189_v2  ;;  %v1508_v14 = vadd.f32 %v3221_v36, %v1478_v9  ;;  %4128 = vmatmul.mubr.f32.gmra.mrb[4].mxu1 %v6189_v2  ;;  %v1823_v36 = vld [vmem:[#allocation3 + $0x140] sm:$0xff]  ;;  %v6224_v4 = vld [vmem:[#allocation2 + $0x12] sm:$0xff] }
 0x239   : > { %v6194_v15 = vmax.f32 %v1509_v7, 0.0  ;;  %4860 = vmatpush3.bf16.msra.mxu1 %v4857_v58  ;;  %4130 = vmatprep.mubr.f32.mxu1 %v6186_v1  ;;  %v4897_v44 = vpack.c.bf16 %v1824_v38, %v1823_v36  ;;  %v1953_v58 = vld [vmem:[#allocation3 + $0x180] sm:$0xff]  ;;  %v1958_v7 = vld [vmem:[#allocation3 + $0x1a8] sm:$0xff]  ;;  %v2094_v36 = vld [vmem:[#allocation3 + $0x218] sm:$0xff] }
 0x23a   : > { %v6197_v32 = vmax.f32 %v1508_v14, 0.0  ;;  %4862 = vmatprep.subr.bf16.mxu1 %v4861_v6  ;;  %v6212_v52 = vld [vmem:[#allocation2 + $0x40] sm:$0xff]  ;;  %v4913_v60 = vpack.c.bf16 %v1954_v59, %v1953_v58  ;;  %v1959_v14 = vld [vmem:[#allocation3 + $0x1b0] sm:$0xff]  ;;  %v2100_v59 = vld [vmem:[#allocation3 + $0x248] sm:$0xff] }
 0x23b   : > { %1546 = vst [vmem:[#allocation2 + $0x81] sm:$0xff] %v6194_v15  ;;  %v6209_v43 = vld [vmem:[#allocation2 + $0x30] sm:$0xff]  ;;  %v6227_v9 = vld [vmem:[#allocation2 + $0x22] sm:$0xff] }
 0x23c   : > { %1545 = vst [vmem:[#allocation2 + $0x71] sm:$0xff] %v6197_v32  ;;  %4131 = vmatmul.mubr.f32.gmra.mrb[6].mxu1 %v6197_v32  ;;  %v6230_v12 = vld [vmem:[#allocation2 + $0x32] sm:$0xff]  ;;  %v6233_v16 = vld [vmem:[#allocation2 + $0x42] sm:$0xff] }
 0x23d   : > { %4864 = vmatpush3.bf16.msra.mxu1 %v4861_v6  ;;  %4165 = vmatprep.mubr.f32.mxu1 %v5452_v62  ;;  %v1957_v6 = vld [vmem:[#allocation3 + $0x1a0] sm:$0xff] }
 0x23e   : > { %4866 = vmatprep.subr.bf16.mxu1 %v4865_v35  ;;  %v6218_v41 = vld [vmem:[#allocation2 + $0x60] sm:$0xff]  ;;  %v4921_v11 = vpack.c.bf16 %v1958_v7, %v1957_v6  ;;  %v2101_v6 = vld [vmem:[#allocation3 + $0x250] sm:$0xff]  ;;  %v2102_v7 = vld [vmem:[#allocation3 + $0x258] sm:$0xff] }
 0x23f   : > { %v6215_v33 = vld [vmem:[#allocation2 + $0x50] sm:$0xff]  ;;  %v2095_v38 = vld [vmem:[#allocation3 + $0x220] sm:$0xff]  ;;  %v4965_v40 = vpack.c.bf16 %v2102_v7, %v2101_v6 }
 0x240   : > { %v2099_v58 = vld [vmem:[#allocation3 + $0x240] sm:$0xff] }
 0x241   : > { %4868 = vmatpush3.bf16.msra.mxu1 %v4865_v35  ;;  %v1960_v35 = vld [vmem:[#allocation3 + $0x1b8] sm:$0xff]  ;;  %v2237_v7 = vld [vmem:[#allocation3 + $0x2c0] sm:$0xff] }
 0x242   : > { %4870 = vmatprep.subr.bf16.mxu1 %v4869_v37  ;;  %v4925_v17 = vpack.c.bf16 %v1960_v35, %v1959_v14  ;;  %v2802_v14 = vld [vmem:[%s6461_s5 + $0x30] sm:$0xff]  ;;  %v2803_v35 = vld [vmem:[%s6461_s5 + $0x38] sm:$0xff] }
 0x243   : > { %v6221_v48 = vld [vmem:[#allocation2 + $0x70] sm:$0xff] }
 0x244   : > { %v6242_v19 = vld [vmem:[#allocation2 + $0x72] sm:$0xff] }
 0x245   : > { %4872 = vmatpush3.bf16.msra.mxu1 %v4869_v37  ;;  %v6236_v37 = vld [vmem:[#allocation2 + $0x52] sm:$0xff] }
 0x246   : > { %4874 = vmatprep.subr.bf16.mxu1 %v4873_v42 }
 0x249   : > { %4876 = vmatpush3.bf16.msra.mxu1 %v4873_v42  ;;  %v6239_v42 = vld [vmem:[#allocation2 + $0x62] sm:$0xff] }
 0x24a   : > { %4878 = vmatprep.subr.bf16.mxu1 %v4877_v20 }
 0x24d   : > { %4880 = vmatpush3.bf16.msra.mxu1 %v4877_v20  ;;  %v1963_v20 = vld [vmem:[#allocation3 + $0x1d0] sm:$0xff] }
 0x24e   : > { %4882 = vmatprep.subr.bf16.mxu1 %v4881_v22  ;;  %v4933_v31 = vpack.c.bf16 %v1964_v21, %v1963_v20  ;;  %v2804_v20 = vld [vmem:[%s6461_s5 + $0x40] sm:$0xff]  ;;  %v2805_v21 = vld [vmem:[%s6461_s5 + $0x48] sm:$0xff] }
 0x250   : > { %4166 = vmatmul.mubr.f32.vlgmr.msra.gmra.mrb[0].mxu1 %v6203_v26 }
 0x251   : > { %4168 = vmatprep.mubr.f32.mxu1 %v6206_v34  ;;  %4884 = vmatpush3.bf16.msra.mxu1 %v4881_v22  ;;  %v1965_v22 = vld [vmem:[#allocation3 + $0x1e0] sm:$0xff] }
 0x252   : > { %4886 = vmatprep.subr.bf16.mxu1 %v4885_v25  ;;  %v4937_v24 = vpack.c.bf16 %v1966_v23, %v1965_v22  ;;  %v2105_v22 = vld [vmem:[#allocation3 + $0x270] sm:$0xff]  ;;  %v2106_v23 = vld [vmem:[#allocation3 + $0x278] sm:$0xff] }
 0x254   : > { %4169 = vmatmul.mubr.f32.gmra.mrb[2].mxu1 %v6209_v43 }
 0x255   : > { %4171 = vmatprep.mubr.f32.mxu1 %v6212_v52  ;;  %4888 = vmatpush3.bf16.msra.mxu1 %v4885_v25  ;;  %v1967_v25 = vld [vmem:[#allocation3 + $0x1f0] sm:$0xff] }
 0x256   : > { %4890 = vmatprep.subr.bf16.mxu1 %v4889_v39  ;;  %v4941_v28 = vpack.c.bf16 %v1968_v27, %v1967_v25  ;;  %v2807_v25 = vld [vmem:[%s6461_s5 + $0x58] sm:$0xff] }
 0x258   : > { %4172 = vmatmul.mubr.f32.gmra.mrb[4].mxu1 %v6215_v33 }
 0x259   : > { %4174 = vmatprep.mubr.f32.mxu1 %v6218_v41  ;;  %4892 = vmatpush3.bf16.msra.mxu1 %v4889_v39  ;;  %v2091_v39 = vld [vmem:[#allocation3 + $0x200] sm:$0xff] }
 0x25a   : > { %4894 = vmatprep.subr.bf16.mxu1 %v4893_v29  ;;  %v4945_v49 = vpack.c.bf16 %v2092_v47, %v2091_v39  ;;  %v2229_v39 = vld [vmem:[#allocation3 + $0x280] sm:$0xff]  ;;  %v2230_v47 = vld [vmem:[#allocation3 + $0x288] sm:$0xff] }
 0x25c   : > { %4175 = vmatmul.mubr.f32.gmra.mrb[6].mxu1 %v6221_v48 }
 0x25d   : > { %4896 = vmatpush3.bf16.msra.mxu1 %v4893_v29  ;;  %4209 = vmatprep.mubr.f32.mxu1 %v1806_v46  ;;  %v2093_v29 = vld [vmem:[#allocation3 + $0x210] sm:$0xff]  ;;  %v2796_v46 = vld [vmem:[%s6461_s5] sm:$0xff] }
 0x25e   : > { %4898 = vmatprep.subr.bf16.mxu1 %v4897_v44  ;;  %v6253_v54 = vpack.c.bf16 %v2797_v50, %v2796_v46  ;;  %v2810_v46 = vld [vmem:[%s6461_s5 + $0x70] sm:$0xff]  ;;  %v2811_v50 = vld [vmem:[%s6461_s5 + $0x78] sm:$0xff] }
 0x260   : > { %5106 = vmatprep.subr.bf16.mxu0 %v6253_v54 }
 0x261   : > { %4900 = vmatpush3.bf16.msra.mxu1 %v4897_v44  ;;  %v2096_v44 = vld [vmem:[#allocation3 + $0x228] sm:$0xff]  ;;  %5108 = vmatpush3.bf16.msra.mxu0 %v6253_v54 }
 0x262   : > { %4902 = vmatprep.subr.bf16.mxu1 %v4901_v0 }
 0x265   : > { %4904 = vmatpush3.bf16.msra.mxu1 %v4901_v0  ;;  %v4953_v0 = vpack.c.bf16 %v2096_v44, %v2095_v38  ;;  %v2231_v38 = vld [vmem:[#allocation3 + $0x290] sm:$0xff]  ;;  %v2232_v44 = vld [vmem:[#allocation3 + $0x298] sm:$0xff] }
 0x266   : > { %4906 = vmatprep.subr.bf16.mxu1 %v4905_v56 }
 0x269   : > { %4908 = vmatpush3.bf16.msra.mxu1 %v4905_v56  ;;  %v2798_v56 = vld [vmem:[%s6461_s5 + $0x10] sm:$0xff] }
 0x26a   : > { %4910 = vmatprep.subr.bf16.mxu1 %v4909_v13  ;;  %v6265_v8 = vpack.c.bf16 %v2799_v5, %v2798_v56  ;;  %v2234_v56 = vld [vmem:[#allocation3 + $0x2a8] sm:$0xff]  ;;  %v3223_v5 = vld [vmem:[%s5597_s15 + $0x1b0] sm:$0xff] }
 0x26b   : > { %4517 = vmatprep.mubr.f32.mxu0 %v3223_v5  ;;  %v6354_v5 = vld [vmem:[#allocation2 + $0x82] sm:$0xff] }
 0x26c   : > { %5110 = vmatprep.subr.bf16.mxu0 %v6265_v8 }
 0x26d   : > { %4912 = vmatpush3.bf16.msra.mxu1 %v4909_v13  ;;  %v4957_v13 = vpack.c.bf16 %v2098_v55, %v2097_v3  ;;  %5112 = vmatpush3.bf16.msra.mxu0 %v6265_v8  ;;  %v4981_v3 = vpack.c.bf16 %v2232_v44, %v2231_v38  ;;  %v2233_v55 = vld [vmem:[#allocation3 + $0x2a0] sm:$0xff]  ;;  %v2374_v44 = vld [vmem:[#allocation3 + $0x330] sm:$0xff] }
 0x26e   : > { %4914 = vmatprep.subr.bf16.mxu1 %v4913_v60 }
 0x270   : > { %4210 = vmatmul.mubr.f32.vlgmr.msra.gmra.mrb[0].mxu1 %v6224_v4 }
 0x271   : > { %4212 = vmatprep.mubr.f32.mxu1 %v6227_v9  ;;  %4916 = vmatpush3.bf16.msra.mxu1 %v4913_v60  ;;  %v2800_v60 = vld [vmem:[%s6461_s5 + $0x20] sm:$0xff] }
 0x272   : > { %4918 = vmatprep.subr.bf16.mxu1 %v4917_v63  ;;  %v6277_v61 = vpack.c.bf16 %v2801_v30, %v2800_v60  ;;  %v2236_v60 = vld [vmem:[#allocation3 + $0x2b8] sm:$0xff]  ;;  %v3225_v30 = vld [vmem:[%s5597_s15 + $0x1d0] sm:$0xff] }
 0x274   : > { %4213 = vmatmul.mubr.f32.gmra.mrb[2].mxu1 %v6230_v12  ;;  %5114 = vmatprep.subr.bf16.mxu0 %v6277_v61 }
 0x275   : > { %4215 = vmatprep.mubr.f32.mxu1 %v6233_v16  ;;  %4920 = vmatpush3.bf16.msra.mxu1 %v4917_v63  ;;  %v4961_v63 = vpack.c.bf16 %v2100_v59, %v2099_v58  ;;  %v4985_v58 = vpack.c.bf16 %v2234_v56, %v2233_v55  ;;  %v2235_v59 = vld [vmem:[#allocation3 + $0x2b0] sm:$0xff]  ;;  %v2377_v55 = vld [vmem:[#allocation3 + $0x348] sm:$0xff] }
 0x276   : > { %4922 = vmatprep.subr.bf16.mxu1 %v4921_v11  ;;  %5116 = vmatpush3.bf16.msra.mxu0 %v6277_v61  ;;  %v4989_v6 = vpack.c.bf16 %v2236_v60, %v2235_v59  ;;  %v2380_v60 = vld [vmem:[#allocation3 + $0x360] sm:$0xff] }
 0x278   : > { %4216 = vmatmul.mubr.f32.gmra.mrb[4].mxu1 %v6236_v37 }
 0x279   : > { %4218 = vmatprep.mubr.f32.mxu1 %v6239_v42  ;;  %4924 = vmatpush3.bf16.msra.mxu1 %v4921_v11  ;;  %v6281_v11 = vld [vmem:[#allocation2 + $0x80] sm:$0xff] }
 0x27a   : > { %4926 = vmatprep.subr.bf16.mxu1 %v4925_v17 }
 0x27c   : > { %4219 = vmatmul.mubr.f32.gmra.mrb[6].mxu1 %v6242_v19 }
 0x27d   : > { %4928 = vmatpush3.bf16.msra.mxu1 %v4925_v17  ;;  %4253 = vmatprep.mubr.f32.mxu1 %v6203_v26  ;;  %v4949_v26 = vpack.c.bf16 %v2094_v36, %v2093_v29  ;;  %v6291_v17 = vpack.c.bf16 %v2803_v35, %v2802_v14  ;;  %v2809_v29 = vld [vmem:[%s6461_s5 + $0x68] sm:$0xff] }
 0x27e   : > { %4930 = vmatprep.subr.bf16.mxu1 %v4929_v45  ;;  %v2238_v14 = vld [vmem:[#allocation3 + $0x2c8] sm:$0xff] }
 0x27f   : > { %5118 = vmatprep.subr.bf16.mxu0 %v6291_v17  ;;  %v4993_v35 = vpack.c.bf16 %v2238_v14, %v2237_v7  ;;  %v2383_v7 = vld [vmem:[#allocation3 + $0x378] sm:$0xff] }
 0x280   : > { %5120 = vmatpush3.bf16.msra.mxu0 %v6291_v17 }
 0x281   : > { %4932 = vmatpush3.bf16.msra.mxu1 %v4929_v45  ;;  %v2104_v45 = vld [vmem:[#allocation3 + $0x268] sm:$0xff] }
 0x282   : > { %4934 = vmatprep.subr.bf16.mxu1 %v4933_v31 }
 0x285   : > { %4936 = vmatpush3.bf16.msra.mxu1 %v4933_v31  ;;  %v6302_v31 = vpack.c.bf16 %v2805_v21, %v2804_v20  ;;  %v2241_v20 = vld [vmem:[#allocation3 + $0x2e0] sm:$0xff]  ;;  %v2242_v21 = vld [vmem:[#allocation3 + $0x2e8] sm:$0xff] }
 0x286   : > { %4938 = vmatprep.subr.bf16.mxu1 %v4937_v24 }
 0x287   : > { %5122 = vmatprep.subr.bf16.mxu0 %v6302_v31 }
 0x288   : > { %5124 = vmatpush3.bf16.msra.mxu0 %v6302_v31 }
 0x289   : > { %4940 = vmatpush3.bf16.msra.mxu1 %v4937_v24  ;;  %v2806_v24 = vld [vmem:[%s6461_s5 + $0x50] sm:$0xff] }
 0x28a   : > { %4942 = vmatprep.subr.bf16.mxu1 %v4941_v28  ;;  %v6312_v27 = vpack.c.bf16 %v2807_v25, %v2806_v24  ;;  %v2368_v25 = vld [vmem:[#allocation3 + $0x300] sm:$0xff] }
 0x28c   : > { %5126 = vmatprep.subr.bf16.mxu0 %v6312_v27 }
 0x28d   : > { %4944 = vmatpush3.bf16.msra.mxu1 %v4941_v28  ;;  %v4973_v28 = vpack.c.bf16 %v2106_v23, %v2105_v22  ;;  %5128 = vmatpush3.bf16.msra.mxu0 %v6312_v27  ;;  %v2243_v22 = vld [vmem:[#allocation3 + $0x2f0] sm:$0xff]  ;;  %v2244_v23 = vld [vmem:[#allocation3 + $0x2f8] sm:$0xff] }
 0x28e   : > { %4946 = vmatprep.subr.bf16.mxu1 %v4945_v49  ;;  %v5005_v24 = vpack.c.bf16 %v2244_v23, %v2243_v22  ;;  %v2512_v23 = vld [vmem:[#allocation3 + $0x3b0] sm:$0xff] }
 0x290   : > { %4254 = vmatmul.mubr.f32.vlgmr.msra.gmra.mrb[0].mxu1 %v6206_v34 }
 0x291   : > { %4256 = vmatprep.mubr.f32.mxu1 %v6209_v43  ;;  %4948 = vmatpush3.bf16.msra.mxu1 %v4945_v49  ;;  %v2808_v49 = vld [vmem:[%s6461_s5 + $0x60] sm:$0xff] }
 0x292   : > { %4950 = vmatprep.subr.bf16.mxu1 %v4949_v26  ;;  %v6322_v36 = vpack.c.bf16 %v2809_v29, %v2808_v49  ;;  %v2371_v49 = vld [vmem:[#allocation3 + $0x318] sm:$0xff]  ;;  %v2372_v29 = vld [vmem:[#allocation3 + $0x320] sm:$0xff] }
 0x294   : > { %4257 = vmatmul.mubr.f32.gmra.mrb[2].mxu1 %v6212_v52  ;;  %5130 = vmatprep.subr.bf16.mxu0 %v6322_v36 }
 0x295   : > { %4259 = vmatprep.mubr.f32.mxu1 %v6215_v33  ;;  %4952 = vmatpush3.bf16.msra.mxu1 %v4949_v26  ;;  %v4977_v26 = vpack.c.bf16 %v2230_v47, %v2229_v39  ;;  %v2370_v47 = vld [vmem:[#allocation3 + $0x310] sm:$0xff] }
 0x296   : > { %4954 = vmatprep.subr.bf16.mxu1 %v4953_v0  ;;  %5132 = vmatpush3.bf16.msra.mxu0 %v6322_v36 }
 0x298   : > { %4260 = vmatmul.mubr.f32.gmra.mrb[4].mxu1 %v6218_v41 }
 0x299   : > { %4262 = vmatprep.mubr.f32.mxu1 %v6221_v48  ;;  %4956 = vmatpush3.bf16.msra.mxu1 %v4953_v0  ;;  %v6332_v0 = vpack.c.bf16 %v2811_v50, %v2810_v46  ;;  %v2375_v46 = vld [vmem:[#allocation3 + $0x338] sm:$0xff] }
 0x29a   : > { %4958 = vmatprep.subr.bf16.mxu1 %v4957_v13  ;;  %v5021_v50 = vpack.c.bf16 %v2375_v46, %v2374_v44  ;;  %v2646_v44 = vld [vmem:[#allocation3 + $0x410] sm:$0xff]  ;;  %v2647_v46 = vld [vmem:[#allocation3 + $0x418] sm:$0xff] }
 0x29b   : > { %5134 = vmatprep.subr.bf16.mxu0 %v6332_v0 }
 0x29c   : > { %4263 = vmatmul.mubr.f32.gmra.mrb[6].mxu1 %v6281_v11  ;;  %5136 = vmatpush3.bf16.msra.mxu0 %v6332_v0 }
 0x29d   : > { %4960 = vmatpush3.bf16.msra.mxu1 %v4957_v13  ;;  %4297 = vmatprep.mubr.f32.mxu1 %v6173_v53  ;;  %v4969_v53 = vpack.c.bf16 %v2104_v45, %v2103_v18  ;;  %v3224_v13 = vld [vmem:[%s5597_s15 + $0x1c0] sm:$0xff]  ;;  %v2240_v18 = vld [vmem:[#allocation3 + $0x2d8] sm:$0xff] }
 0x29e   : > { %4962 = vmatprep.subr.bf16.mxu1 %v4961_v63 }
 0x29f   : > { %4518 = vmatmul.mubr.f32.vlgmr.msra.gmra.mrb[8].mxu0 %v3224_v13  ;;  %v2378_v13 = vld [vmem:[#allocation3 + $0x350] sm:$0xff] }
 0x2a0   : > { %4520 = vmatprep.mubr.f32.mxu0 %v3225_v30  ;;  %v2381_v30 = vld [vmem:[#allocation3 + $0x368] sm:$0xff] }
 0x2a1   : > { %4964 = vmatpush3.bf16.msra.mxu1 %v4961_v63  ;;  %v3226_v63 = vld [vmem:[%s5597_s15 + $0x1e0] sm:$0xff] }
 0x2a2   : > { %4966 = vmatprep.subr.bf16.mxu1 %v4965_v40 }
 0x2a3   : > { %4521 = vmatmul.mubr.f32.gmra.mrb[10].mxu0 %v3226_v63  ;;  %v5033_v63 = vpack.c.bf16 %v2381_v30, %v2380_v60  ;;  %v2653_v60 = vld [vmem:[#allocation3 + $0x448] sm:$0xff]  ;;  %v2654_v30 = vld [vmem:[#allocation3 + $0x450] sm:$0xff] }
 0x2a5   : > { %4968 = vmatpush3.bf16.msra.mxu1 %v4965_v40  ;;  %v2239_v40 = vld [vmem:[#allocation3 + $0x2d0] sm:$0xff] }
 0x2a6   : > { %4970 = vmatprep.subr.bf16.mxu1 %v4969_v53  ;;  %v4997_v45 = vpack.c.bf16 %v2240_v18, %v2239_v40  ;;  %v2507_v40 = vld [vmem:[#allocation3 + $0x388] sm:$0xff] }
 0x2a9   : > { %4972 = vmatpush3.bf16.msra.mxu1 %v4969_v53  ;;  %v5001_v53 = vpack.c.bf16 %v2242_v21, %v2241_v20  ;;  %v2509_v20 = vld [vmem:[#allocation3 + $0x398] sm:$0xff]  ;;  %v2510_v21 = vld [vmem:[#allocation3 + $0x3a0] sm:$0xff] }
 0x2aa   : > { %4974 = vmatprep.subr.bf16.mxu1 %v4973_v28 }
 0x2ad   : > { %4976 = vmatpush3.bf16.msra.mxu1 %v4973_v28  ;;  %v2369_v28 = vld [vmem:[#allocation3 + $0x308] sm:$0xff] }
 0x2ae   : > { %4978 = vmatprep.subr.bf16.mxu1 %v4977_v26  ;;  %v5009_v39 = vpack.c.bf16 %v2369_v28, %v2368_v25  ;;  %v2514_v28 = vld [vmem:[#allocation3 + $0x3c0] sm:$0xff] }
 0x2b0   : > { %4298 = vmatmul.mubr.f32.vlgmr.msra.gmra.mrb[0].mxu1 %v6171_v51 }
 0x2b1   : > { %4300 = vmatprep.mubr.f32.mxu1 %v6181_v10  ;;  %4980 = vmatpush3.bf16.msra.mxu1 %v4977_v26  ;;  %v2373_v26 = vld [vmem:[#allocation3 + $0x328] sm:$0xff] }
 0x2b2   : > { %4982 = vmatprep.subr.bf16.mxu1 %v4981_v3  ;;  %v5017_v38 = vpack.c.bf16 %v2373_v26, %v2372_v29  ;;  %v2521_v29 = vld [vmem:[#allocation3 + $0x3f8] sm:$0xff]  ;;  %v2644_v26 = vld [vmem:[#allocation3 + $0x400] sm:$0xff] }
 0x2b4   : > { %4301 = vmatmul.mubr.f32.gmra.mrb[2].mxu1 %v6178_v57 }
 0x2b5   : > { %4303 = vmatprep.mubr.f32.mxu1 %v6189_v2  ;;  %4984 = vmatpush3.bf16.msra.mxu1 %v4981_v3  ;;  %v2376_v3 = vld [vmem:[#allocation3 + $0x340] sm:$0xff] }
 0x2b6   : > { %4986 = vmatprep.subr.bf16.mxu1 %v4985_v58  ;;  %v5025_v56 = vpack.c.bf16 %v2377_v55, %v2376_v3  ;;  %v2649_v3 = vld [vmem:[#allocation3 + $0x428] sm:$0xff] }
 0x2b8   : > { %4304 = vmatmul.mubr.f32.gmra.mrb[4].mxu1 %v6186_v1 }
 0x2b9   : > { %4306 = vmatprep.mubr.f32.mxu1 %v6197_v32  ;;  %4988 = vmatpush3.bf16.msra.mxu1 %v4985_v58  ;;  %v2379_v58 = vld [vmem:[#allocation3 + $0x358] sm:$0xff] }
 0x2ba   : > { %4990 = vmatprep.subr.bf16.mxu1 %v4989_v6  ;;  %v5029_v59 = vpack.c.bf16 %v2379_v58, %v2378_v13  ;;  %v2651_v13 = vld [vmem:[#allocation3 + $0x438] sm:$0xff] }
 0x2bc   : > { %4307 = vmatmul.mubr.f32.gmra.mrb[6].mxu1 %v6194_v15 }
 0x2bd   : > { %4992 = vmatpush3.bf16.msra.mxu1 %v4989_v6  ;;  %4341 = vmatprep.mubr.f32.mxu1 %v6224_v4  ;;  %v5013_v4 = vpack.c.bf16 %v2371_v49, %v2370_v47  ;;  %v2382_v6 = vld [vmem:[#allocation3 + $0x370] sm:$0xff]  ;;  %v2517_v47 = vld [vmem:[#allocation3 + $0x3d8] sm:$0xff]  ;;  %v2519_v49 = vld [vmem:[#allocation3 + $0x3e8] sm:$0xff] }
 0x2be   : > { %4994 = vmatprep.subr.bf16.mxu1 %v4993_v35  ;;  %v5037_v14 = vpack.c.bf16 %v2383_v7, %v2382_v6  ;;  %v2657_v6 = vld [vmem:[#allocation3 + $0x468] sm:$0xff] }
 0x2c1   : > { %4996 = vmatpush3.bf16.msra.mxu1 %v4993_v35  ;;  %v2506_v35 = vld [vmem:[#allocation3 + $0x380] sm:$0xff] }
 0x2c2   : > { %4998 = vmatprep.subr.bf16.mxu1 %v4997_v45  ;;  %v5041_v18 = vpack.c.bf16 %v2507_v40, %v2506_v35 }
 0x2c5   : > { %5000 = vmatpush3.bf16.msra.mxu1 %v4997_v45  ;;  %v2508_v45 = vld [vmem:[#allocation3 + $0x390] sm:$0xff] }
 0x2c6   : > { %5002 = vmatprep.subr.bf16.mxu1 %v5001_v53 }
 0x2c9   : > { %5004 = vmatpush3.bf16.msra.mxu1 %v5001_v53  ;;  %v2511_v53 = vld [vmem:[#allocation3 + $0x3a8] sm:$0xff] }
 0x2ca   : > { %5006 = vmatprep.subr.bf16.mxu1 %v5005_v24  ;;  %v5049_v22 = vpack.c.bf16 %v2511_v53, %v2510_v21 }
 0x2cd   : > { %5008 = vmatpush3.bf16.msra.mxu1 %v5005_v24  ;;  %v2513_v24 = vld [vmem:[#allocation3 + $0x3b8] sm:$0xff] }
 0x2ce   : > { %5010 = vmatprep.subr.bf16.mxu1 %v5009_v39  ;;  %v5053_v25 = vpack.c.bf16 %v2513_v24, %v2512_v23 }
 0x2d0   : > { %4342 = vmatmul.mubr.f32.vlgmr.msra.gmra.mrb[0].mxu1 %v6227_v9 }
 0x2d1   : > { %4344 = vmatprep.mubr.f32.mxu1 %v6230_v12  ;;  %5012 = vmatpush3.bf16.msra.mxu1 %v5009_v39  ;;  %v2515_v39 = vld [vmem:[#allocation3 + $0x3c8] sm:$0xff] }
 0x2d2   : > { %5014 = vmatprep.subr.bf16.mxu1 %v5013_v4 }
 0x2d4   : > { %4345 = vmatmul.mubr.f32.gmra.mrb[2].mxu1 %v6233_v16 }
 0x2d5   : > { %4347 = vmatprep.mubr.f32.mxu1 %v6236_v37  ;;  %5016 = vmatpush3.bf16.msra.mxu1 %v5013_v4 }
 0x2d6   : > { %5018 = vmatprep.subr.bf16.mxu1 %v5017_v38 }
 0x2d8   : > { %4348 = vmatmul.mubr.f32.gmra.mrb[4].mxu1 %v6239_v42 }
 0x2d9   : > { %4350 = vmatprep.mubr.f32.mxu1 %v6242_v19  ;;  %5020 = vmatpush3.bf16.msra.mxu1 %v5017_v38  ;;  %v2645_v38 = vld [vmem:[#allocation3 + $0x408] sm:$0xff] }
 0x2da   : > { %5022 = vmatprep.subr.bf16.mxu1 %v5021_v50 }
 0x2dc   : > { %4351 = vmatmul.mubr.f32.gmra.mrb[6].mxu1 %v6354_v5 }
 0x2dd   : > { %5024 = vmatpush3.bf16.msra.mxu1 %v5021_v50  ;;  %4385 = vmatprep.mubr.f32.mxu1 %v6206_v34  ;;  %v5045_v34 = vpack.c.bf16 %v2509_v20, %v2508_v45  ;;  %v2648_v50 = vld [vmem:[#allocation3 + $0x420] sm:$0xff] }
 0x2de   : > { %5026 = vmatprep.subr.bf16.mxu1 %v5025_v56  ;;  %v5081_v55 = vpack.c.bf16 %v2649_v3, %v2648_v50 }
 0x2e1   : > { %5028 = vmatpush3.bf16.msra.mxu1 %v5025_v56  ;;  %v2650_v56 = vld [vmem:[#allocation3 + $0x430] sm:$0xff] }
 0x2e2   : > { %5030 = vmatprep.subr.bf16.mxu1 %v5029_v59  ;;  %v5085_v58 = vpack.c.bf16 %v2651_v13, %v2650_v56 }
 0x2e5   : > { %5032 = vmatpush3.bf16.msra.mxu1 %v5029_v59  ;;  %v2652_v59 = vld [vmem:[#allocation3 + $0x440] sm:$0xff] }
 0x2e6   : > { %5034 = vmatprep.subr.bf16.mxu1 %v5033_v63 }
 0x2e9   : > { %5036 = vmatpush3.bf16.msra.mxu1 %v5033_v63  ;;  %v2655_v63 = vld [vmem:[#allocation3 + $0x458] sm:$0xff] }
 0x2ea   : > { %5038 = vmatprep.subr.bf16.mxu1 %v5037_v14 }
 0x2ed   : > { %5040 = vmatpush3.bf16.msra.mxu1 %v5037_v14  ;;  %v2659_v14 = vld [vmem:[#allocation3 + $0x478] sm:$0xff] }
 0x2ee   : > { %5042 = vmatprep.subr.bf16.mxu1 %v5041_v18 }
 0x2f0   : > { %4386 = vmatmul.mubr.f32.vlgmr.msra.gmra.mrb[0].mxu1 %v6209_v43  ;;  %v5057_v43 = vpack.c.bf16 %v2515_v39, %v2514_v28 }
 0x2f1   : > { %4388 = vmatprep.mubr.f32.mxu1 %v6212_v52  ;;  %5044 = vmatpush3.bf16.msra.mxu1 %v5041_v18  ;;  %v2516_v52 = vld [vmem:[#allocation3 + $0x3d0] sm:$0xff] }
 0x2f2   : > { %5046 = vmatprep.subr.bf16.mxu1 %v5045_v34 }
 0x2f4   : > { %4389 = vmatmul.mubr.f32.gmra.mrb[2].mxu1 %v6215_v33  ;;  %v5061_v33 = vpack.c.bf16 %v2517_v47, %v2516_v52 }
 0x2f5   : > { %4391 = vmatprep.mubr.f32.mxu1 %v6218_v41  ;;  %5048 = vmatpush3.bf16.msra.mxu1 %v5045_v34  ;;  %v2518_v41 = vld [vmem:[#allocation3 + $0x3e0] sm:$0xff] }
 0x2f6   : > { %5050 = vmatprep.subr.bf16.mxu1 %v5049_v22  ;;  %v5065_v4 = vpack.c.bf16 %v2519_v49, %v2518_v41 }
 0x2f8   : > { %4392 = vmatmul.mubr.f32.gmra.mrb[4].mxu1 %v6221_v48  ;;  %v2520_v48 = vld [vmem:[#allocation3 + $0x3f0] sm:$0xff] }
 0x2f9   : > { %4394 = vmatprep.mubr.f32.mxu1 %v6281_v11  ;;  %5052 = vmatpush3.bf16.msra.mxu1 %v5049_v22  ;;  %v5069_v11 = vpack.c.bf16 %v2521_v29, %v2520_v48 }
 0x2fa   : > { %5054 = vmatprep.subr.bf16.mxu1 %v5053_v25 }
 0x2fc   : > { %4395 = vmatmul.mubr.f32.gmra.mrb[6].mxu1 %v5452_v62  ;;  %v5073_v62 = vpack.c.bf16 %v2645_v38, %v2644_v26 }
 0x2fd   : > { %5056 = vmatpush3.bf16.msra.mxu1 %v5053_v25  ;;  %4429 = vmatprep.mubr.f32.mxu1 %v6171_v51  ;;  %v5077_v51 = vpack.c.bf16 %v2647_v46, %v2646_v44 }
 0x2fe   : > { %5058 = vmatprep.subr.bf16.mxu1 %v5057_v43 }
 0x301   : > { %5060 = vmatpush3.bf16.msra.mxu1 %v5057_v43 }
 0x302   : > { %5062 = vmatprep.subr.bf16.mxu1 %v5061_v33 }
 0x305   : > { %5064 = vmatpush3.bf16.msra.mxu1 %v5061_v33 }
 0x306   : > { %5066 = vmatprep.subr.bf16.mxu1 %v5065_v4 }
 0x309   : > { %5068 = vmatpush3.bf16.msra.mxu1 %v5065_v4 }
 0x30a   : > { %5070 = vmatprep.subr.bf16.mxu1 %v5069_v11 }
 0x30d   : > { %5072 = vmatpush3.bf16.msra.mxu1 %v5069_v11 }
 0x30e   : > { %5074 = vmatprep.subr.bf16.mxu1 %v5073_v62 }
 0x310   : > { %4430 = vmatmul.mubr.f32.vlgmr.msra.gmra.mrb[0].mxu1 %v6181_v10  ;;  %v5089_v10 = vpack.c.bf16 %v2653_v60, %v2652_v59 }
 0x311   : > { %4432 = vmatprep.mubr.f32.mxu1 %v6178_v57  ;;  %5076 = vmatpush3.bf16.msra.mxu1 %v5073_v62  ;;  %v2504_v57 = vld [vmem:[#allocation2 + $0x91] sm:$0xff] }
 0x312   : > { %5078 = vmatprep.subr.bf16.mxu1 %v5077_v51 }
 0x314   : > { %4433 = vmatmul.mubr.f32.gmra.mrb[2].mxu1 %v6189_v2  ;;  %v2656_v2 = vld [vmem:[#allocation3 + $0x460] sm:$0xff] }
 0x315   : > { %4435 = vmatprep.mubr.f32.mxu1 %v6186_v1  ;;  %5080 = vmatpush3.bf16.msra.mxu1 %v5077_v51  ;;  %v5093_v1 = vpack.c.bf16 %v2655_v63, %v2654_v30  ;;  %v5097_v7 = vpack.c.bf16 %v2657_v6, %v2656_v2 }
 0x316   : > { %5082 = vmatprep.subr.bf16.mxu1 %v5081_v55 }
 0x318   : > { %4436 = vmatmul.mubr.f32.gmra.mrb[4].mxu1 %v6197_v32  ;;  %v2658_v32 = vld [vmem:[#allocation3 + $0x470] sm:$0xff] }
 0x319   : > { %4438 = vmatprep.mubr.f32.mxu1 %v6194_v15  ;;  %5084 = vmatpush3.bf16.msra.mxu1 %v5081_v55  ;;  %v5101_v15 = vpack.c.bf16 %v2659_v14, %v2658_v32 }
 0x31a   : > { %5086 = vmatprep.subr.bf16.mxu1 %v5085_v58 }
 0x31c   : > { %4439 = vmatmul.mubr.f32.gmra.mrb[6].mxu1 %v2504_v57 }
 0x31d   : > { %5088 = vmatpush3.bf16.msra.mxu1 %v5085_v58  ;;  %4473 = vmatprep.mubr.f32.mxu1 %v6227_v9  ;;  %v2642_v9 = vld [vmem:[#allocation2 + $0x92] sm:$0xff] }
 0x31e   : > { %5090 = vmatprep.subr.bf16.mxu1 %v5089_v10 }
 0x321   : > { %5092 = vmatpush3.bf16.msra.mxu1 %v5089_v10 }
 0x322   : > { %5094 = vmatprep.subr.bf16.mxu1 %v5093_v1 }
 0x325   : > { %5096 = vmatpush3.bf16.msra.mxu1 %v5093_v1 }
 0x326   : > { %5098 = vmatprep.subr.bf16.mxu1 %v5097_v7 }
 0x329   : > { %5100 = vmatpush3.bf16.msra.mxu1 %v5097_v7 }
 0x32a   : > { %5102 = vmatprep.subr.bf16.mxu1 %v5101_v15 }
 0x32d   : > { %5104 = vmatpush3.bf16.msra.mxu1 %v5101_v15 }
 0x32e   : > { %5137 = vmatprep.subr.bf16.mxu1 %v6253_v54 }
 0x330   : > { %4474 = vmatmul.mubr.f32.vlgmr.msra.gmra.mrb[0].mxu1 %v6230_v12  ;;  %v3227_v12 = vld [vmem:[%s5597_s15 + $0x1f0] sm:$0xff] }
 0x331   : > { %4476 = vmatprep.mubr.f32.mxu1 %v6233_v16  ;;  %5145 = vmatpush3.bf16.msra.mxu1 %v6253_v54  ;;  %v3228_v16 = vld [vmem:[%s5597_s15 + $0x200] sm:$0xff] }
 0x332   : > { %5138 = vmatprep.subr.bf16.mxu1 %v6265_v8 }
 0x334   : > { %4477 = vmatmul.mubr.f32.gmra.mrb[2].mxu1 %v6236_v37  ;;  %v3229_v37 = vld [vmem:[%s5597_s15 + $0x210] sm:$0xff] }
 0x335   : > { %4479 = vmatprep.mubr.f32.mxu1 %v6239_v42  ;;  %5146 = vmatpush3.bf16.msra.mxu1 %v6265_v8  ;;  %v3230_v42 = vld [vmem:[%s5597_s15 + $0x220] sm:$0xff]  ;;  %s259_s15 = scalar_lea.vmem [#allocation6], %s3035_s17 }
 0x336   : > { %5139 = vmatprep.subr.bf16.mxu1 %v6277_v61  ;;  %s2955_s18 = sshll.u32 %s259_s15, 4  ;;  %s6406_s18 = int_to_ptr.vmem [resolvable:$true] %s2955_s18 }
 0x337   : > { %s5381_s29 = scalar_lea.vmem %s6406_s18, 1024  ;;  %p5388_p2 = scmp.lt.s32.totalorder %s6406_s18, %s5386_s13 }
 0x338   : > { %4480 = vmatmul.mubr.f32.gmra.mrb[4].mxu1 %v6242_v19  ;;  %p5382_p6 = scmp.ne.s32.totalorder %s6406_s18, %s5381_s29  ;;  %p5389_p3 = scmp.lt.s32.totalorder %s5387_s12, %s5381_s29 }
 0x339   : > { %4482 = vmatprep.mubr.f32.mxu1 %v6354_v5  ;;  %5147 = vmatpush3.bf16.msra.mxu1 %v6277_v61 }
 0x33a   : > { %5140 = vmatprep.subr.bf16.mxu1 %v6291_v17  ;;  %p5383_p10 = pnand %p5382_p6, %p6473_p9  ;;  %p5390_p4 = por %p5389_p3, %p5388_p2 }
 0x33c   : > { %4483 = vmatmul.mubr.f32.gmra.mrb[6].mxu1 %v2642_v9  ;;  %p5384_p12 = pneg %p5383_p10 }
 0x33d   : > { %5148 = vmatpush3.bf16.msra.mxu1 %v6291_v17  ;;  %4523 = vmatprep.mubr.f32.mxu1 %v3227_v12  ;;  %v3222_v17 = vld [vmem:[%s6460_s4] ss:$0 sm:$0xff] }
 0x33e   : > { %5141 = vmatprep.subr.bf16.mxu1 %v6302_v31  ;;  %p5391_p7 = pnand %p5390_p4, %p5384_p12 }
 0x341   : > { %5149 = vmatpush3.bf16.msra.mxu1 %v6302_v31 }
 0x342   : > { %5142 = vmatprep.subr.bf16.mxu1 %v6312_v27 }
 0x345   : > { %5150 = vmatpush3.bf16.msra.mxu1 %v6312_v27 }
 0x346   : > { %5143 = vmatprep.subr.bf16.mxu1 %v6322_v36 }
 0x349   : > { %5151 = vmatpush3.bf16.msra.mxu1 %v6322_v36 }
 0x34a   : > { %5144 = vmatprep.subr.bf16.mxu1 %v6332_v0 }
 0x34d   : > { %5152 = vmatpush3.bf16.msra.mxu1 %v6332_v0 }
 0x350   : > { %4524 = vmatmul.mubr.f32.vlgmr.msra.gmra.mrb[4].mxu1 %v3228_v16 }
 0x351   : > { %4526 = vmatprep.mubr.f32.mxu1 %v3229_v37 }
 0x354   : > { %4527 = vmatmul.mubr.f32.gmra.mrb[6].mxu1 %v3230_v42 }
 0x372   : > { %v4519_v19 = vpop.f32.mrb[8].mxu0 }
 0x373   : > { %v2878_v54 = vpop.f32.mrb[9].mxu0 }
 0x376   : > { %v4522_v8 = vpop.f32.mrb[10].mxu0 }
 0x377   : > { %v2888_v61 = vpop.f32.mrb[11].mxu0 }
 0x403   : > { %v4475_v31 = vpop.f32.mrb[0].mxu1 }
 0x404   : > { %v5153_v27 = vadd.f32 %v4475_v31, %v3222_v17  ;;  %v2726_v36 = vpop.f32.mrb[1].mxu1 }
 0x405   : > { %v5155_v0 = vadd.f32 %v3222_v17, %v2726_v36 }
 0x406   : > { %v5154_v5 = vadd.f32 %v5153_v27, %v4519_v19 }
 0x407   : > { %v5156_v35 = vadd.f32 %v5155_v0, %v2878_v54  ;;  %v4478_v40 = vpop.f32.mrb[2].mxu1 }
 0x408   : > { %v2926_v18 = vmax.f32 %v5154_v5, 0.0  ;;  %v5157_v45 = vadd.f32 %v4478_v40, %v3222_v17  ;;  %v2736_v20 = vpop.f32.mrb[3].mxu1 }
 0x409   : > { %v2925_v34 = vmax.f32 %v5156_v35, 0.0  ;;  %v5159_v21 = vadd.f32 %v3222_v17, %v2736_v20 }
 0x40a   : > { %2934 = vst [vmem:[%s259_s15 + $0x8] sm:$0xff] %v2926_v18  ;;  %v5158_v53 = vadd.f32 %v5157_v45, %v4522_v8 }
 0x40b   : > { %2933 = vst [vmem:[%s259_s15] sm:$0xff] %v2925_v34  ;;  %v5160_v22 = vadd.f32 %v5159_v21, %v2888_v61 }
 0x40c   : > { %v2928_v23 = vmax.f32 %v5158_v53, 0.0 }
 0x40d   : > { %v2927_v24 = vmax.f32 %v5160_v22, 0.0 }
 0x40e   : > { %2936 = vst [vmem:[%s259_s15 + $0x18] sm:$0xff] %v2928_v23 }
 0x40f   : > { %2935 = vst [vmem:[%s259_s15 + $0x10] sm:$0xff] %v2927_v24 }
 0x423   : > { %v4525_v25 = vpop.f32.mrb[4].mxu1 }
 0x424   : > { %v5161_v28 = vadd.f32 %v4525_v25, %v3222_v17  ;;  %v2898_v39 = vpop.f32.mrb[5].mxu1 }
 0x425   : > { %v5162_v43 = vadd.f32 %v3222_v17, %v2898_v39 }
 0x426   : > { %v2930_v52 = vmax.f32 %v5161_v28, 0.0 }
 0x427   : > { %v2929_v47 = vmax.f32 %v5162_v43, 0.0  ;;  %v4528_v33 = vpop.f32.mrb[6].mxu1 }
 0x428   : > { %2938 = vst [vmem:[%s259_s15 + $0x28] sm:$0xff] %v2930_v52  ;;  %v5163_v41 = vadd.f32 %v4528_v33, %v3222_v17  ;;  %v2908_v49 = vpop.f32.mrb[7].mxu1 }
 0x429   : > { %2937 = vst [vmem:[%s259_s15 + $0x20] sm:$0xff] %v2929_v47  ;;  %v5164_v4 = vadd.f32 %v3222_v17, %v2908_v49 }
 0x42a   : > { %v2932_v48 = vmax.f32 %v5163_v41, 0.0 }
 0x42b   : > { %v2931_v29 = vmax.f32 %v5164_v4, 0.0 }
 0x42c   : > { %2940 = vst [vmem:[%s259_s15 + $0x38] sm:$0xff] %v2932_v48 }
 0x42d   : > { %2939 = vst [vmem:[%s259_s15 + $0x30] sm:$0xff] %v2931_v29 }
 0x42e   : > { %5394 = shalt.err (!%p5391_p7)
}
 0x42f   : > { %s5395_s16 = scalar_lea.hbm %s6411_s28, 1024  ;;  %s5399_s14 = scalar_lea.hbm %s6462_s6, 2048 }
 0x430   : > { %p5396_p8 = scmp.ne.s32.totalorder %s6411_s28, %s5395_s16  ;;  %p5400_p1 = scmp.lt.u32.totalorder %s6411_s28, %s6462_s6 }
 0x431   : > { %p5401_p0 = scmp.lt.u32.totalorder %s5399_s14, %s5395_s16  ;;  %p5403_p6 = scmp.lt.u32.totalorder %s5395_s16, %s6411_s28 }
 0x432   : > { %p5397_p11 = pnand %p5396_p8, %p6473_p9 }
 0x433   : > { %p5402_p5 = por %p5401_p0, %p5400_p1 }
 0x434   : > { %p5398_p13 = pneg %p5397_p11 }
 0x435   : > { %p5404_p10 = por %p5403_p6, %p5402_p5 }
 0x437   : > { %p5405_p12 = pnand %p5404_p10, %p5398_p13 }
 0x439   : > { %5408 = shalt.err (!%p5405_p12)
}
 0x43a   : > { %s5454_s19 = smov 128   ;;  %s5455_s20 = smov 8  }
 0x43b   : > { %5302 = dma.vmem_to_hbm [thread:$0]  (%p6473_p9), %s6406_s18, 1024, %s6411_s28, %s6415_s25, %s5454_s19, %s5454_s19, %s5455_s20  }
 0x43c PF: > { %p5314_p2 = scmp.ge.s32.totalorder %s5447_s24, 2  ;;  %s2970_s26 = sand.u32 1, %s5435_s21  }
 0x43d   : > { %p6474_p3 = scmp.ne.s32.totalorder %s6467_s8, 0  ;;  %s2971_s29 = scalar_lea.sflag [#allocation5], %s2970_s26 }
 0x43f   : > { %p5309_p4 = pnand %p5314_p2, %p6474_p3 }
 0x441   : > { %5430 = dma.done.wait (!%p5309_p4), %s2971_s29, 1024  }
 0x442   : > { %5432 = vsyncadd (!%p5309_p4), %s2971_s29, 4294966272  ;;  %p17_p7 = scmp.ge.s32.totalorder %s5516_s27, 4   ;;  %s6475_s21 = smov %s5439_s22 }
 0x443   : > { %s6476_s22 = smov %s5443_s23  ;;  %s6477_s23 = smov %s5527_s30 }
 0x444   : > { %s6478_s24 = smov %s5516_s27  ;;  %19 = sbr.rel (!%p17_p7) target bundleno = 4 (0x4), region = 107 }
 0x44b   :  { %2976 = vsyncpa [#allocation4], 1 }
 0x44c   :  { %2978 = vsyncpa [#allocation4 + $0x1], 1 }
 0x44d   :  { %2979 = vsyncpa [#allocation5], 1 }
 0x44e   :  { %2981 = vsyncpa [#allocation5 + $0x1], 1 }

</bundles_post_ra>
